<compile_context>
chip_gen: v5e
topology: v5e:2x2
jax: 0.10.0
libtpu: 0.0.40
codegen_flags: <defaults>
</compile_context>

<pallas_src>
import functools
import math

import jax
import jax.numpy as jnp
from jax.experimental import pallas as pl
from jax.experimental.pallas import tpu as pltpu


# ----------------------------------------------------------------------------
# helpers
# ----------------------------------------------------------------------------
def _round_up(x, m):
    return ((x + m - 1) // m) * m


def _pad2(x, rows, cols):
    return jnp.pad(x, ((0, rows - x.shape[0]), (0, cols - x.shape[1])))


def _dim_plan(n, m_tile, k_tile):
    """Plan one node dimension: returns (padded_n, m_tile_eff, k_tile_eff).

    The dimension is padded to a multiple of the effective M tile; the effective
    K tile is the largest multiple of the M tile (<= k_tile) that divides the
    padded size, so grids are always exact and tiles never silently shrink below
    what the data allows.
    """
    m_tile = max(128, (m_tile // 128) * 128)
    k_tile = max(m_tile, (k_tile // m_tile) * m_tile)
    r = _round_up(n, 128)
    mt = min(m_tile, r)
    n_pad = _round_up(r, mt)
    n_blocks = n_pad // mt
    kt = mt
    for mult in range(min(k_tile // mt, n_blocks), 0, -1):
        if n_blocks % mult == 0:
            kt = mt * mult
            break
    return n_pad, mt, kt


_VMEM_CAP_CACHE = None


def _vmem_cap_bytes():
    """Per-generation VMEM cap: ~48 MiB on v7x (64 MiB phys), ~96 MiB on v5e/v6e."""
    global _VMEM_CAP_CACHE
    if _VMEM_CAP_CACHE is None:
        cap = 48 << 20  # safe default: fits v7x's 64 MiB physical VMEM per TC
        try:
            info = pltpu.get_tpu_info()
            phys = int(getattr(info, "vmem_capacity_bytes", 0) or 0)
            if phys > 0:
                cap = int(min(phys * 3 // 4, 96 << 20))
        except Exception:
            pass
        _VMEM_CAP_CACHE = cap
    return _VMEM_CAP_CACHE


def _vmem_limit_bytes(blocks):
    """blocks: iterable of (shape, dtype, n_buffers). Footprint * 2 headroom, clamped."""
    total = 0
    for shape, dtype, bufs in blocks:
        total += math.prod(shape) * jnp.dtype(dtype).itemsize * bufs
    return int(min(max(2 * total, 32 << 20), _vmem_cap_bytes()))


# ----------------------------------------------------------------------------
# kernels  (every K-step is a single adj_tile @ support_tile MXU op)
# ----------------------------------------------------------------------------
def _spmm_proj_kernel(adj_ref, s_ref, b_ref, w_ref, out_ref, acc_ref, *, alpha):
    """out = leaky_relu(adj @ s + b) @ W   (pass 1: gc2 fused with the W4 projection)."""
    k = pl.program_id(1)

    @pl.when(k == 0)
    def _():
        acc_ref[...] = jnp.zeros_like(acc_ref)

    acc_ref[...] += jnp.dot(adj_ref[...], s_ref[...],
                            preferred_element_type=jnp.float32)

    @pl.when(k == pl.num_programs(1) - 1)
    def _():
        z = acc_ref[...] + b_ref[...]
        ho = jnp.where(z > 0, z, alpha * z).astype(w_ref.dtype)
        out_ref[...] = jnp.dot(ho, w_ref[...],
                               preferred_element_type=jnp.float32).astype(out_ref.dtype)


def _vu_fused_kernel(adj_ref, s1_ref, s4_ref, b1_ref, b4_ref, w3_ref,
                     fea_ref, wit_ref, wib_ref, bi_ref,
                     supp3_ref, item_ref, acc1_ref, acc2_ref, *, alpha):
    """Single VU pass, each VU tile streamed once and used twice:
         acc1 += VU @ (ufea@W1)  -> supp3 = leaky(acc1+b1) @ W3          (feeds gc3)
         acc2 += VU @ supp4      -> Item  = relu(leaky(acc2+b4) @ Wi_t
                                               + vfea @ Wi_b + bi)       (gc4+union)
    """
    k = pl.program_id(1)

    @pl.when(k == 0)
    def _():
        acc1_ref[...] = jnp.zeros_like(acc1_ref)
        acc2_ref[...] = jnp.zeros_like(acc2_ref)

    a = adj_ref[...]
    acc1_ref[...] += jnp.dot(a, s1_ref[...], preferred_element_type=jnp.float32)
    acc2_ref[...] += jnp.dot(a, s4_ref[...], preferred_element_type=jnp.float32)

    @pl.when(k == pl.num_programs(1) - 1)
    def _():
        z1 = acc1_ref[...] + b1_ref[...]
        user_ho = jnp.where(z1 > 0, z1, alpha * z1).astype(w3_ref.dtype)
        supp3_ref[...] = jnp.dot(user_ho, w3_ref[...],
                                 preferred_element_type=jnp.float32).astype(supp3_ref.dtype)

        z2 = acc2_ref[...] + b4_ref[...]
        item_ho = jnp.where(z2 > 0, z2, alpha * z2).astype(wit_ref.dtype)
        y = (jnp.dot(item_ho, wit_ref[...], preferred_element_type=jnp.float32)
             + jnp.dot(fea_ref[...], wib_ref[...], preferred_element_type=jnp.float32)
             + bi_ref[...])
        item_ref[...] = jnp.maximum(y, 0.0).astype(item_ref.dtype)


def _spmm_union_kernel(adj_ref, s_ref, b_ref, fea_ref, wt_ref, wb_ref, bu_ref,
                       out_ref, acc_ref, *, alpha):
    """Pass 3: gc3 + user_union:
         out = relu(leaky(adj @ s + b) @ W_top + fea @ W_bot + bu)
    (== relu(cat(leaky(adj @ s + b), fea) @ W_union + bu))
    """
    k = pl.program_id(1)

    @pl.when(k == 0)
    def _():
        acc_ref[...] = jnp.zeros_like(acc_ref)

    acc_ref[...] += jnp.dot(adj_ref[...], s_ref[...],
                            preferred_element_type=jnp.float32)

    @pl.when(k == pl.num_programs(1) - 1)
    def _():
        z = acc_ref[...] + b_ref[...]
        ho = jnp.where(z > 0, z, alpha * z).astype(wt_ref.dtype)
        y = (jnp.dot(ho, wt_ref[...], preferred_element_type=jnp.float32)
             + jnp.dot(fea_ref[...], wb_ref[...], preferred_element_type=jnp.float32)
             + bu_ref[...])
        out_ref[...] = jnp.maximum(y, 0.0).astype(out_ref.dtype)


# ----------------------------------------------------------------------------
# pallas_call wrappers (tiled, pipelined)
# ----------------------------------------------------------------------------
def _spmm_proj(adj, s, b, w, *, alpha, mt, kt):
    M, K = adj.shape
    H = s.shape[1]
    N = w.shape[1]
    vmem = _vmem_limit_bytes([
        ((mt, kt), adj.dtype, 2),         # streamed adjacency tile
        ((kt, H), s.dtype, 2),            # streamed support tile
        (b.shape, b.dtype, 2),            # resident bias
        (w.shape, w.dtype, 2),            # resident post-projection weight
        ((mt, N), jnp.bfloat16, 2),       # output tile
        ((mt, H), jnp.float32, 1),        # accumulator scratch
    ])
    return pl.pallas_call(
        functools.partial(_spmm_proj_kernel, alpha=alpha),
        out_shape=jax.ShapeDtypeStruct((M, N), jnp.bfloat16),
        grid_spec=pltpu.PrefetchScalarGridSpec(
            num_scalar_prefetch=0,
            grid=(M // mt, K // kt),
            in_specs=[
                pl.BlockSpec((mt, kt), lambda i, k: (i, k)),   # adj
                pl.BlockSpec((kt, H), lambda i, k: (k, 0)),    # support (vfea@W2)
                pl.BlockSpec(b.shape, lambda i, k: (0, 0)),    # b2 (resident)
                pl.BlockSpec(w.shape, lambda i, k: (0, 0)),    # W4 (resident)
            ],
            out_specs=pl.BlockSpec((mt, N), lambda i, k: (i, 0)),
            scratch_shapes=[pltpu.VMEM((mt, H), jnp.float32)],
        ),
        compiler_params=pltpu.CompilerParams(
            dimension_semantics=("parallel", "arbitrary"),
            vmem_limit_bytes=vmem,
        ),
    )(adj, s, b, w)


def _vu_fused(adj, s1, s4, b1, b4, w3, fea, wit, wib, bi, *, alpha, mt, kt):
    M, K = adj.shape
    H = s1.shape[1]
    N = s4.shape[1]
    vmem = _vmem_limit_bytes([
        ((mt, kt), adj.dtype, 2),
        ((kt, H), s1.dtype, 2),
        ((kt, N), s4.dtype, 2),
        (b1.shape, b1.dtype, 2),
        (b4.shape, b4.dtype, 2),
        (w3.shape, w3.dtype, 2),
        ((mt, N), fea.dtype, 2),
        (wit.shape, wit.dtype, 2),
        (wib.shape, wib.dtype, 2),
        (bi.shape, bi.dtype, 2),
        ((mt, N), jnp.bfloat16, 2),       # supp3 output tile
        ((mt, N), jnp.float32, 2),        # item output tile
        ((mt, H), jnp.float32, 1),        # acc1
        ((mt, N), jnp.float32, 1),        # acc2
    ])
    return pl.pallas_call(
        functools.partial(_vu_fused_kernel, alpha=alpha),
        out_shape=(jax.ShapeDtypeStruct((M, N), jnp.bfloat16),
                   jax.ShapeDtypeStruct((M, N), jnp.float32)),
        grid_spec=pltpu.PrefetchScalarGridSpec(
            num_scalar_prefetch=0,
            grid=(M // mt, K // kt),
            in_specs=[
                pl.BlockSpec((mt, kt), lambda i, k: (i, k)),    # VU tile
                pl.BlockSpec((kt, H), lambda i, k: (k, 0)),     # supp1 = ufea@W1
                pl.BlockSpec((kt, N), lambda i, k: (k, 0)),     # supp4 = item_ho@W4
                pl.BlockSpec(b1.shape, lambda i, k: (0, 0)),    # b1 (resident)
                pl.BlockSpec(b4.shape, lambda i, k: (0, 0)),    # b4 (resident)
                pl.BlockSpec(w3.shape, lambda i, k: (0, 0)),    # W3 (resident)
                pl.BlockSpec((mt, N), lambda i, k: (i, 0)),     # vfea row tile
                pl.BlockSpec(wit.shape, lambda i, k: (0, 0)),   # Wi top (resident)
                pl.BlockSpec(wib.shape, lambda i, k: (0, 0)),   # Wi bottom (resident)
                pl.BlockSpec(bi.shape, lambda i, k: (0, 0)),    # bi (resident)
            ],
            out_specs=[
                pl.BlockSpec((mt, N), lambda i, k: (i, 0)),     # supp3
                pl.BlockSpec((mt, N), lambda i, k: (i, 0)),     # item
            ],
            scratch_shapes=[pltpu.VMEM((mt, H), jnp.float32),
                            pltpu.VMEM((mt, N), jnp.float32)],
        ),
        compiler_params=pltpu.CompilerParams(
            dimension_semantics=("parallel", "arbitrary"),
            vmem_limit_bytes=vmem,
        ),
    )(adj, s1, s4, b1, b4, w3, fea, wit, wib, bi)


def _spmm_union(adj, s, b, fea, wt, wb, bu, *, alpha, mt, kt):
    M, K = adj.shape
    N = s.shape[1]
    vmem = _vmem_limit_bytes([
        ((mt, kt), adj.dtype, 2),
        ((kt, N), s.dtype, 2),
        (b.shape, b.dtype, 2),
        ((mt, N), fea.dtype, 2),
        (wt.shape, wt.dtype, 2),
        (wb.shape, wb.dtype, 2),
        (bu.shape, bu.dtype, 2),
        ((mt, N), jnp.float32, 2),
        ((mt, N), jnp.float32, 1),
    ])
    return pl.pallas_call(
        functools.partial(_spmm_union_kernel, alpha=alpha),
        out_shape=jax.ShapeDtypeStruct((M, N), jnp.float32),
        grid_spec=pltpu.PrefetchScalarGridSpec(
            num_scalar_prefetch=0,
            grid=(M // mt, K // kt),
            in_specs=[
                pl.BlockSpec((mt, kt), lambda i, k: (i, k)),    # UV tile
                pl.BlockSpec((kt, N), lambda i, k: (k, 0)),     # supp3 tile
                pl.BlockSpec(b.shape, lambda i, k: (0, 0)),     # b3 (resident)
                pl.BlockSpec((mt, N), lambda i, k: (i, 0)),     # ufea row tile
                pl.BlockSpec(wt.shape, lambda i, k: (0, 0)),    # Wu top (resident)
                pl.BlockSpec(wb.shape, lambda i, k: (0, 0)),    # Wu bottom (resident)
                pl.BlockSpec(bu.shape, lambda i, k: (0, 0)),    # bu (resident)
            ],
            out_specs=pl.BlockSpec((mt, N), lambda i, k: (i, 0)),
            scratch_shapes=[pltpu.VMEM((mt, N), jnp.float32)],
        ),
        compiler_params=pltpu.CompilerParams(
            dimension_semantics=("parallel", "arbitrary"),
            vmem_limit_bytes=vmem,
        ),
    )(adj, s, b, fea, wt, wb, bu)


# ----------------------------------------------------------------------------
# GNN forward (eval mode: dropout = identity)
# ----------------------------------------------------------------------------
def gnn_forward(ufea, vfea, UV_adj, VU_adj, params, *, alpha,
                m_tile=512, k_tile=2048):
    """Returns (learn_user, learn_item) with the original (unpadded) shapes."""
    n_users, F = ufea.shape
    n_items = vfea.shape[0]
    H = params["w1"].shape[1]

    F_pad = _round_up(F, 128)
    H_pad = _round_up(H, 128)
    nu_pad, mt_u, kt_u = _dim_plan(n_users, m_tile, k_tile)
    ni_pad, mt_i, kt_i = _dim_plan(n_items, m_tile, k_tile)

    bf16, f32 = jnp.bfloat16, jnp.float32

    # Hoisted feature projections (tiny matmuls): done once in f32, then streamed
    # as bf16 support tiles -- removes the per-M-tile x@W recompute and its cast.
    supp1 = ufea @ params["w1"]       # (n_users, H)  feeds gc1 (VU pass)
    supp2 = vfea @ params["w2"]       # (n_items, H)  feeds gc2 (UV pass 1)

    supp1_p = _pad2(supp1, nu_pad, H_pad).astype(bf16)
    supp2_p = _pad2(supp2, ni_pad, H_pad).astype(bf16)
    ufea_p = _pad2(ufea, nu_pad, F_pad).astype(bf16)
    vfea_p = _pad2(vfea, ni_pad, F_pad).astype(bf16)
    uv = _pad2(UV_adj, nu_pad, ni_pad).astype(bf16)
    vu = _pad2(VU_adj, ni_pad, nu_pad).astype(bf16)

    w3 = _pad2(params["w3"], H_pad, F_pad).astype(bf16)
    w4 = _pad2(params["w4"], H_pad, F_pad).astype(bf16)
    b1 = _pad2(params["b1"].reshape(1, -1), 1, H_pad).astype(f32)
    b2 = _pad2(params["b2"].reshape(1, -1), 1, H_pad).astype(f32)
    b3 = _pad2(params["b3"].reshape(1, -1), 1, F_pad).astype(f32)
    b4 = _pad2(params["b4"].reshape(1, -1), 1, F_pad).astype(f32)

    # Union weights pre-split (concat == split matmul): no in-kernel slicing.
    wu_t = _pad2(params["wu"][:F], F_pad, F_pad).astype(bf16)
    wu_b = _pad2(params["wu"][F:], F_pad, F_pad).astype(bf16)
    wi_t = _pad2(params["wi"][:F], F_pad, F_pad).astype(bf16)
    wi_b = _pad2(params["wi"][F:], F_pad, F_pad).astype(bf16)
    bu = _pad2(params["bu"].reshape(1, -1), 1, F_pad).astype(f32)
    bi = _pad2(params["bi"].reshape(1, -1), 1, F_pad).astype(f32)

    # Pass 1 (UV): supp4 = leaky(UV @ supp2 + b2) @ W4          -> (nu_pad, F_pad)
    supp4 = _spmm_proj(uv, supp2_p, b2, w4, alpha=alpha, mt=mt_u, kt=kt_i)

    # Pass 2 (VU, streamed once): supp3 = leaky(VU@supp1+b1)@W3 and final Item.
    supp3, item = _vu_fused(vu, supp1_p, supp4, b1, b4, w3, vfea_p,
                            wi_t, wi_b, bi, alpha=alpha, mt=mt_i, kt=kt_u)

    # Pass 3 (UV): final User = relu(leaky(UV@supp3+b3)@Wu_t + ufea@Wu_b + bu).
    user = _spmm_union(uv, supp3, b3, ufea_p, wu_t, wu_b, bu,
                       alpha=alpha, mt=mt_u, kt=kt_i)

    return user[:n_users, :F], item[:n_items, :F]


# ----------------------------------------------------------------------------
# Pure-JAX reference (exact f32 math) for a correctness check.
# ----------------------------------------------------------------------------
def gnn_forward_ref(ufea, vfea, UV_adj, VU_adj, p, *, alpha):
    def leaky(x):
        return jnp.where(x > 0, x, alpha * x)

    user_ho = leaky(VU_adj @ (ufea @ p["w1"]) + p["b1"])
    item_ho = leaky(UV_adj @ (vfea @ p["w2"]) + p["b2"])
    user_ho = leaky(UV_adj @ (user_ho @ p["w3"]) + p["b3"])
    item_ho = leaky(VU_adj @ (item_ho @ p["w4"]) + p["b4"])
    user = jnp.concatenate([user_ho, ufea], axis=1) @ p["wu"] + p["bu"]
    item = jnp.concatenate([item_ho, vfea], axis=1) @ p["wi"] + p["bi"]
    return jnp.maximum(user, 0.0), jnp.maximum(item, 0.0)


# ----------------------------------------------------------------------------
# main
# ----------------------------------------------------------------------------
if __name__ == "__main__":
    def run_case(n_users, n_items, feature_dim, hidden_dim, alpha, seed, m_tile, k_tile):
        key = jax.random.PRNGKey(seed)
        ks = jax.random.split(key, 16)

        ufea = jax.random.normal(ks[0], (n_users, feature_dim), jnp.float32)
        vfea = jax.random.normal(ks[1], (n_items, feature_dim), jnp.float32)
        # Dense synthetic normalized adjacencies (torch.spmm == dense matmul semantics).
        UV_adj = jax.random.uniform(ks[2], (n_users, n_items), jnp.float32) / n_items
        VU_adj = jax.random.uniform(ks[3], (n_items, n_users), jnp.float32) / n_users

        def init_w(k, shape):
            return 0.1 * jax.random.normal(k, shape, jnp.float32)

        # Weights stored as (in_features, out_features); applied as x @ W + b
        # (equivalent to PyTorch x @ W_torch.T + b with W = W_torch.T).
        params = {
            "w1": init_w(ks[4], (feature_dim, hidden_dim)),
            "b1": init_w(ks[5], (1, hidden_dim)),
            "w2": init_w(ks[6], (feature_dim, hidden_dim)),
            "b2": init_w(ks[7], (1, hidden_dim)),
            "w3": init_w(ks[8], (hidden_dim, feature_dim)),
            "b3": init_w(ks[9], (1, feature_dim)),
            "w4": init_w(ks[10], (hidden_dim, feature_dim)),
            "b4": init_w(ks[11], (1, feature_dim)),
            "wu": init_w(ks[12], (2 * feature_dim, feature_dim)),
            "bu": init_w(ks[13], (1, feature_dim)),
            "wi": init_w(ks[14], (2 * feature_dim, feature_dim)),
            "bi": init_w(ks[15], (1, feature_dim)),
        }
        # TODO(synk): score_function1/2 from GNN.__init__ are unused in forward; not implemented.

        fwd = jax.jit(functools.partial(gnn_forward, alpha=alpha,
                                        m_tile=m_tile, k_tile=k_tile))
        user, item = fwd(ufea, vfea, UV_adj, VU_adj, params)
        jax.block_until_ready((user, item))

        ref_u, ref_i = gnn_forward_ref(ufea, vfea, UV_adj, VU_adj, params, alpha=alpha)
        assert user.shape == (n_users, feature_dim)
        assert item.shape == (n_items, feature_dim)
        # bf16 streamed operands with f32 accumulation -> loose-ish tolerance vs f32 ref.
        err_u = float(jnp.max(jnp.abs(user - ref_u)))
        err_i = float(jnp.max(jnp.abs(item - ref_i)))
        assert jnp.allclose(user, ref_u, atol=5e-2, rtol=5e-2), err_u
        assert jnp.allclose(item, ref_i, atol=5e-2, rtol=5e-2), err_i

    # Case 1: tiny config from the module (feature_dim=32, hidden_dim=16, leakey=0.1);
    #         everything pads to a single 128x128 tile per pass (grid = (1, 1)).
    run_case(n_users=16, n_items=8, feature_dim=32, hidden_dim=16,
             alpha=0.1, seed=0, m_tile=512, k_tile=2048)

    # Case 2: small explicit tiles -> multi-tile grids (M-parallel / K-accumulation path).
    run_case(n_users=300, n_items=220, feature_dim=40, hidden_dim=24,
             alpha=0.1, seed=1, m_tile=128, k_tile=256)

    # Case 3: default (large) tiles with node counts requiring pad-and-divide.
    run_case(n_users=640, n_items=520, feature_dim=64, hidden_dim=32,
             alpha=0.1, seed=2, m_tile=512, k_tile=2048)

    print("KERNEL_OK")
</pallas_src>

<mosaic_0001>
module attributes {stable_mosaic.version = 11 : i64} {
  func.func @_spmm_proj_kernel(%arg0: i32, %arg1: i32, %arg2: memref<128x128xbf16, #tpu.memory_space<vmem>>, %arg3: memref<128x128xbf16, #tpu.memory_space<vmem>>, %arg4: memref<1x128xf32, #tpu.memory_space<vmem>>, %arg5: memref<128x128xbf16, #tpu.memory_space<vmem>>, %arg6: memref<128x128xbf16, #tpu.memory_space<vmem>>, %arg7: memref<128x128xf32, #tpu.memory_space<vmem>>) attributes {dimension_semantics = [#tpu.dimension_semantics<parallel>, #tpu.dimension_semantics<arbitrary>], iteration_bounds = array<i64: 1, 1>, scalar_prefetch = 0 : i64, scratch_operands = 1 : i64, tpu.core_type = #tpu.core_type<tc>, window_params = [{transform_indices = @transform_0, window_bounds = array<i64: 128, 128>}, {transform_indices = @transform_1, window_bounds = array<i64: 128, 128>}, {pipeline_mode = #tpu.pipeline_mode<synchronous>, transform_indices = @transform_2, window_bounds = array<i64: 1, 128>}, {pipeline_mode = #tpu.pipeline_mode<synchronous>, transform_indices = @transform_3, window_bounds = array<i64: 128, 128>}, {transform_indices = @transform_4, window_bounds = array<i64: 128, 128>}]} {
    %c0_i32 = arith.constant 0 : i32
    %0 = arith.cmpi eq, %arg1, %c0_i32 : i32
    %1 = arith.extui %0 : i1 to i32
    %c0_i32_0 = arith.constant 0 : i32
    %2 = arith.cmpi ne, %1, %c0_i32_0 : i32
    scf.if %2 {
      %cst_10 = arith.constant 0.000000e+00 : f32
      %12 = vector.broadcast %cst_10 : f32 to vector<128x128xf32>
      %c0_11 = arith.constant 0 : index
      %c0_12 = arith.constant 0 : index
      %13 = vector.load %arg7[%c0_11, %c0_12] : memref<128x128xf32, #tpu.memory_space<vmem>>, vector<128x128xf32>
      tpu.vector_store %arg7[%c0_11, %c0_12], %12 {strides = array<i32>} : memref<128x128xf32, #tpu.memory_space<vmem>>, vector<128x128xf32>,
    } else {
    }
    %c0 = arith.constant 0 : index
    %c0_1 = arith.constant 0 : index
    %3 = vector.load %arg7[%c0, %c0_1] : memref<128x128xf32, #tpu.memory_space<vmem>>, vector<128x128xf32>
    %c0_2 = arith.constant 0 : index
    %c0_3 = arith.constant 0 : index
    %4 = vector.load %arg2[%c0_2, %c0_3] : memref<128x128xbf16, #tpu.memory_space<vmem>>, vector<128x128xbf16>
    %c0_4 = arith.constant 0 : index
    %c0_5 = arith.constant 0 : index
    %5 = vector.load %arg3[%c0_4, %c0_5] : memref<128x128xbf16, #tpu.memory_space<vmem>>, vector<128x128xbf16>
    %cst = arith.constant dense<0.000000e+00> : vector<128x128xf32>
    %6 = tpu.matmul %4, %5, %cst {dimension_numbers = #tpu.dot_dimension_numbers<[1], [0], [0], [1], [0, 0, 1, 1], [], []>} : vector<128x128xbf16>, vector<128x128xbf16>, vector<128x128xf32> -> vector<128x128xf32>
    %7 = arith.addf %3, %6 : vector<128x128xf32>
    %c0_6 = arith.constant 0 : index
    %c0_7 = arith.constant 0 : index
    %8 = vector.load %arg7[%c0_6, %c0_7] : memref<128x128xf32, #tpu.memory_space<vmem>>, vector<128x128xf32>
    tpu.vector_store %arg7[%c0_6, %c0_7], %7 {strides = array<i32>} : memref<128x128xf32, #tpu.memory_space<vmem>>, vector<128x128xf32>,
    %c0_i32_8 = arith.constant 0 : i32
    %9 = arith.cmpi eq, %arg1, %c0_i32_8 : i32
    %10 = arith.extui %9 : i1 to i32
    %c0_i32_9 = arith.constant 0 : i32
    %11 = arith.cmpi ne, %10, %c0_i32_9 : i32
    scf.if %11 {
      %c0_10 = arith.constant 0 : index
      %c0_11 = arith.constant 0 : index
      %12 = vector.load %arg7[%c0_10, %c0_11] : memref<128x128xf32, #tpu.memory_space<vmem>>, vector<128x128xf32>
      %c0_12 = arith.constant 0 : index
      %c0_13 = arith.constant 0 : index
      %13 = vector.load %arg4[%c0_12, %c0_13] : memref<1x128xf32, #tpu.memory_space<vmem>>, vector<1x128xf32>
      %14 = vector.broadcast %13 : vector<1x128xf32> to vector<128x128xf32>
      %15 = arith.addf %12, %14 : vector<128x128xf32>
      %cst_14 = arith.constant 0.000000e+00 : f32
      %16 = vector.broadcast %cst_14 : f32 to vector<128x128xf32>
      %17 = arith.cmpf ogt, %15, %16 : vector<128x128xf32>
      %cst_15 = arith.constant 1.000000e-01 : f32
      %18 = vector.broadcast %cst_15 : f32 to vector<128x128xf32>
      %19 = arith.mulf %18, %15 : vector<128x128xf32>
      %20 = arith.select %17, %15, %19 : vector<128x128xi1>, vector<128x128xf32>
      %21 = arith.truncf %20 : vector<128x128xf32> to vector<128x128xbf16>
      %c0_16 = arith.constant 0 : index
      %c0_17 = arith.constant 0 : index
      %22 = vector.load %arg5[%c0_16, %c0_17] : memref<128x128xbf16, #tpu.memory_space<vmem>>, vector<128x128xbf16>
      %cst_18 = arith.constant dense<0.000000e+00> : vector<128x128xf32>
      %23 = tpu.matmul %21, %22, %cst_18 {dimension_numbers = #tpu.dot_dimension_numbers<[1], [0], [0], [1], [0, 0, 1, 1], [], []>} : vector<128x128xbf16>, vector<128x128xbf16>, vector<128x128xf32> -> vector<128x128xf32>
      %24 = arith.truncf %23 : vector<128x128xf32> to vector<128x128xbf16>
      %c0_19 = arith.constant 0 : index
      %c0_20 = arith.constant 0 : index
      %25 = vector.load %arg6[%c0_19, %c0_20] : memref<128x128xbf16, #tpu.memory_space<vmem>>, vector<128x128xbf16>
      tpu.vector_store %arg6[%c0_19, %c0_20], %24 {strides = array<i32>} : memref<128x128xbf16, #tpu.memory_space<vmem>>, vector<128x128xbf16>,
    } else {
    }
    return
  }
  func.func @transform_0(%arg0: i32, %arg1: i32) -> (i32, i32) {
    %c0_i32 = arith.constant 0 : i32
    return %arg0, %arg1 : i32, i32
  }
  func.func @transform_1(%arg0: i32, %arg1: i32) -> (i32, i32) {
    %c0_i32 = arith.constant 0 : i32
    %c0_i32_0 = arith.constant 0 : i32
    return %arg1, %c0_i32 : i32, i32
  }
  func.func @transform_2(%arg0: i32, %arg1: i32) -> (i32, i32) {
    %c0_i32 = arith.constant 0 : i32
    %c0_i32_0 = arith.constant 0 : i32
    %c0_i32_1 = arith.constant 0 : i32
    return %c0_i32, %c0_i32_0 : i32, i32
  }
  func.func @transform_3(%arg0: i32, %arg1: i32) -> (i32, i32) {
    %c0_i32 = arith.constant 0 : i32
    %c0_i32_0 = arith.constant 0 : i32
    %c0_i32_1 = arith.constant 0 : i32
    return %c0_i32, %c0_i32_0 : i32, i32
  }
  func.func @transform_4(%arg0: i32, %arg1: i32) -> (i32, i32) {
    %c0_i32 = arith.constant 0 : i32
    %c0_i32_0 = arith.constant 0 : i32
    return %arg0, %c0_i32 : i32, i32
  }
}

module attributes {stable_mosaic.version = 11 : i64} {
  func.func @_spmm_union_kernel(%arg0: i32, %arg1: i32, %arg2: memref<128x128xbf16, #tpu.memory_space<vmem>>, %arg3: memref<128x128xbf16, #tpu.memory_space<vmem>>, %arg4: memref<1x128xf32, #tpu.memory_space<vmem>>, %arg5: memref<128x128xbf16, #tpu.memory_space<vmem>>, %arg6: memref<128x128xbf16, #tpu.memory_space<vmem>>, %arg7: memref<128x128xbf16, #tpu.memory_space<vmem>>, %arg8: memref<1x128xf32, #tpu.memory_space<vmem>>, %arg9: memref<128x128xf32, #tpu.memory_space<vmem>>, %arg10: memref<128x128xf32, #tpu.memory_space<vmem>>) attributes {dimension_semantics = [#tpu.dimension_semantics<parallel>, #tpu.dimension_semantics<arbitrary>], iteration_bounds = array<i64: 1, 1>, scalar_prefetch = 0 : i64, scratch_operands = 1 : i64, tpu.core_type = #tpu.core_type<tc>, window_params = [{transform_indices = @transform_0, window_bounds = array<i64: 128, 128>}, {transform_indices = @transform_1, window_bounds = array<i64: 128, 128>}, {pipeline_mode = #tpu.pipeline_mode<synchronous>, transform_indices = @transform_2, window_bounds = array<i64: 1, 128>}, {transform_indices = @transform_3, window_bounds = array<i64: 128, 128>}, {pipeline_mode = #tpu.pipeline_mode<synchronous>, transform_indices = @transform_4, window_bounds = array<i64: 128, 128>}, {pipeline_mode = #tpu.pipeline_mode<synchronous>, transform_indices = @transform_5, window_bounds = array<i64: 128, 128>}, {pipeline_mode = #tpu.pipeline_mode<synchronous>, transform_indices = @transform_6, window_bounds = array<i64: 1, 128>}, {transform_indices = @transform_7, window_bounds = array<i64: 128, 128>}]} {
    %c0_i32 = arith.constant 0 : i32
    %0 = arith.cmpi eq, %arg1, %c0_i32 : i32
    %1 = arith.extui %0 : i1 to i32
    %c0_i32_0 = arith.constant 0 : i32
    %2 = arith.cmpi ne, %1, %c0_i32_0 : i32
    scf.if %2 {
      %cst_10 = arith.constant 0.000000e+00 : f32
      %12 = vector.broadcast %cst_10 : f32 to vector<128x128xf32>
      %c0_11 = arith.constant 0 : index
      %c0_12 = arith.constant 0 : index
      %13 = vector.load %arg10[%c0_11, %c0_12] : memref<128x128xf32, #tpu.memory_space<vmem>>, vector<128x128xf32>
      tpu.vector_store %arg10[%c0_11, %c0_12], %12 {strides = array<i32>} : memref<128x128xf32, #tpu.memory_space<vmem>>, vector<128x128xf32>,
    } else {
    }
    %c0 = arith.constant 0 : index
    %c0_1 = arith.constant 0 : index
    %3 = vector.load %arg10[%c0, %c0_1] : memref<128x128xf32, #tpu.memory_space<vmem>>, vector<128x128xf32>
    %c0_2 = arith.constant 0 : index
    %c0_3 = arith.constant 0 : index
    %4 = vector.load %arg2[%c0_2, %c0_3] : memref<128x128xbf16, #tpu.memory_space<vmem>>, vector<128x128xbf16>
    %c0_4 = arith.constant 0 : index
    %c0_5 = arith.constant 0 : index
    %5 = vector.load %arg3[%c0_4, %c0_5] : memref<128x128xbf16, #tpu.memory_space<vmem>>, vector<128x128xbf16>
    %cst = arith.constant dense<0.000000e+00> : vector<128x128xf32>
    %6 = tpu.matmul %4, %5, %cst {dimension_numbers = #tpu.dot_dimension_numbers<[1], [0], [0], [1], [0, 0, 1, 1], [], []>} : vector<128x128xbf16>, vector<128x128xbf16>, vector<128x128xf32> -> vector<128x128xf32>
    %7 = arith.addf %3, %6 : vector<128x128xf32>
    %c0_6 = arith.constant 0 : index
    %c0_7 = arith.constant 0 : index
    %8 = vector.load %arg10[%c0_6, %c0_7] : memref<128x128xf32, #tpu.memory_space<vmem>>, vector<128x128xf32>
    tpu.vector_store %arg10[%c0_6, %c0_7], %7 {strides = array<i32>} : memref<128x128xf32, #tpu.memory_space<vmem>>, vector<128x128xf32>,
    %c0_i32_8 = arith.constant 0 : i32
    %9 = arith.cmpi eq, %arg1, %c0_i32_8 : i32
    %10 = arith.extui %9 : i1 to i32
    %c0_i32_9 = arith.constant 0 : i32
    %11 = arith.cmpi ne, %10, %c0_i32_9 : i32
    scf.if %11 {
      %c0_10 = arith.constant 0 : index
      %c0_11 = arith.constant 0 : index
      %12 = vector.load %arg10[%c0_10, %c0_11] : memref<128x128xf32, #tpu.memory_space<vmem>>, vector<128x128xf32>
      %c0_12 = arith.constant 0 : index
      %c0_13 = arith.constant 0 : index
      %13 = vector.load %arg4[%c0_12, %c0_13] : memref<1x128xf32, #tpu.memory_space<vmem>>, vector<1x128xf32>
      %14 = vector.broadcast %13 : vector<1x128xf32> to vector<128x128xf32>
      %15 = arith.addf %12, %14 : vector<128x128xf32>
      %cst_14 = arith.constant 0.000000e+00 : f32
      %16 = vector.broadcast %cst_14 : f32 to vector<128x128xf32>
      %17 = arith.cmpf ogt, %15, %16 : vector<128x128xf32>
      %cst_15 = arith.constant 1.000000e-01 : f32
      %18 = vector.broadcast %cst_15 : f32 to vector<128x128xf32>
      %19 = arith.mulf %18, %15 : vector<128x128xf32>
      %20 = arith.select %17, %15, %19 : vector<128x128xi1>, vector<128x128xf32>
      %21 = arith.truncf %20 : vector<128x128xf32> to vector<128x128xbf16>
      %c0_16 = arith.constant 0 : index
      %c0_17 = arith.constant 0 : index
      %22 = vector.load %arg6[%c0_16, %c0_17] : memref<128x128xbf16, #tpu.memory_space<vmem>>, vector<128x128xbf16>
      %cst_18 = arith.constant dense<0.000000e+00> : vector<128x128xf32>
      %23 = tpu.matmul %21, %22, %cst_18 {dimension_numbers = #tpu.dot_dimension_numbers<[1], [0], [0], [1], [0, 0, 1, 1], [], []>} : vector<128x128xbf16>, vector<128x128xbf16>, vector<128x128xf32> -> vector<128x128xf32>
      %c0_19 = arith.constant 0 : index
      %c0_20 = arith.constant 0 : index
      %24 = vector.load %arg5[%c0_19, %c0_20] : memref<128x128xbf16, #tpu.memory_space<vmem>>, vector<128x128xbf16>
      %c0_21 = arith.constant 0 : index
      %c0_22 = arith.constant 0 : index
      %25 = vector.load %arg7[%c0_21, %c0_22] : memref<128x128xbf16, #tpu.memory_space<vmem>>, vector<128x128xbf16>
      %cst_23 = arith.constant dense<0.000000e+00> : vector<128x128xf32>
      %26 = tpu.matmul %24, %25, %cst_23 {dimension_numbers = #tpu.dot_dimension_numbers<[1], [0], [0], [1], [0, 0, 1, 1], [], []>} : vector<128x128xbf16>, vector<128x128xbf16>, vector<128x128xf32> -> vector<128x128xf32>
      %27 = arith.addf %23, %26 : vector<128x128xf32>
      %c0_24 = arith.constant 0 : index
      %c0_25 = arith.constant 0 : index
      %28 = vector.load %arg8[%c0_24, %c0_25] : memref<1x128xf32, #tpu.memory_space<vmem>>, vector<1x128xf32>
      %29 = vector.broadcast %28 : vector<1x128xf32> to vector<128x128xf32>
      %30 = arith.addf %27, %29 : vector<128x128xf32>
      %cst_26 = arith.constant 0.000000e+00 : f32
      %31 = vector.broadcast %cst_26 : f32 to vector<128x128xf32>
      %32 = arith.maximumf %30, %31 : vector<128x128xf32>
      %c0_27 = arith.constant 0 : index
      %c0_28 = arith.constant 0 : index
      %33 = vector.load %arg9[%c0_27, %c0_28] : memref<128x128xf32, #tpu.memory_space<vmem>>, vector<128x128xf32>
      tpu.vector_store %arg9[%c0_27, %c0_28], %32 {strides = array<i32>} : memref<128x128xf32, #tpu.memory_space<vmem>>, vector<128x128xf32>,
    } else {
    }
    return
  }
  func.func @transform_0(%arg0: i32, %arg1: i32) -> (i32, i32) {
    %c0_i32 = arith.constant 0 : i32
    return %arg0, %arg1 : i32, i32
  }
  func.func @transform_1(%arg0: i32, %arg1: i32) -> (i32, i32) {
    %c0_i32 = arith.constant 0 : i32
    %c0_i32_0 = arith.constant 0 : i32
    return %arg1, %c0_i32 : i32, i32
  }
  func.func @transform_2(%arg0: i32, %arg1: i32) -> (i32, i32) {
    %c0_i32 = arith.constant 0 : i32
    %c0_i32_0 = arith.constant 0 : i32
    %c0_i32_1 = arith.constant 0 : i32
    return %c0_i32, %c0_i32_0 : i32, i32
  }
  func.func @transform_3(%arg0: i32, %arg1: i32) -> (i32, i32) {
    %c0_i32 = arith.constant 0 : i32
    %c0_i32_0 = arith.constant 0 : i32
    return %arg0, %c0_i32 : i32, i32
  }
  func.func @transform_4(%arg0: i32, %arg1: i32) -> (i32, i32) {
    %c0_i32 = arith.constant 0 : i32
    %c0_i32_0 = arith.constant 0 : i32
    %c0_i32_1 = arith.constant 0 : i32
    return %c0_i32, %c0_i32_0 : i32, i32
  }
  func.func @transform_5(%arg0: i32, %arg1: i32) -> (i32, i32) {
    %c0_i32 = arith.constant 0 : i32
    %c0_i32_0 = arith.constant 0 : i32
    %c0_i32_1 = arith.constant 0 : i32
    return %c0_i32, %c0_i32_0 : i32, i32
  }
  func.func @transform_6(%arg0: i32, %arg1: i32) -> (i32, i32) {
    %c0_i32 = arith.constant 0 : i32
    %c0_i32_0 = arith.constant 0 : i32
    %c0_i32_1 = arith.constant 0 : i32
    return %c0_i32, %c0_i32_0 : i32, i32
  }
  func.func @transform_7(%arg0: i32, %arg1: i32) -> (i32, i32) {
    %c0_i32 = arith.constant 0 : i32
    %c0_i32_0 = arith.constant 0 : i32
    return %arg0, %c0_i32 : i32, i32
  }
}

module attributes {stable_mosaic.version = 11 : i64} {
  func.func @_vu_fused_kernel(%arg0: i32, %arg1: i32, %arg2: memref<128x128xbf16, #tpu.memory_space<vmem>>, %arg3: memref<128x128xbf16, #tpu.memory_space<vmem>>, %arg4: memref<128x128xbf16, #tpu.memory_space<vmem>>, %arg5: memref<1x128xf32, #tpu.memory_space<vmem>>, %arg6: memref<1x128xf32, #tpu.memory_space<vmem>>, %arg7: memref<128x128xbf16, #tpu.memory_space<vmem>>, %arg8: memref<128x128xbf16, #tpu.memory_space<vmem>>, %arg9: memref<128x128xbf16, #tpu.memory_space<vmem>>, %arg10: memref<128x128xbf16, #tpu.memory_space<vmem>>, %arg11: memref<1x128xf32, #tpu.memory_space<vmem>>, %arg12: memref<128x128xbf16, #tpu.memory_space<vmem>>, %arg13: memref<128x128xf32, #tpu.memory_space<vmem>>, %arg14: memref<128x128xf32, #tpu.memory_space<vmem>>, %arg15: memref<128x128xf32, #tpu.memory_space<vmem>>) attributes {dimension_semantics = [#tpu.dimension_semantics<parallel>, #tpu.dimension_semantics<arbitrary>], iteration_bounds = array<i64: 1, 1>, scalar_prefetch = 0 : i64, scratch_operands = 2 : i64, tpu.core_type = #tpu.core_type<tc>, window_params = [{transform_indices = @transform_0, window_bounds = array<i64: 128, 128>}, {transform_indices = @transform_1, window_bounds = array<i64: 128, 128>}, {transform_indices = @transform_2, window_bounds = array<i64: 128, 128>}, {pipeline_mode = #tpu.pipeline_mode<synchronous>, transform_indices = @transform_3, window_bounds = array<i64: 1, 128>}, {pipeline_mode = #tpu.pipeline_mode<synchronous>, transform_indices = @transform_4, window_bounds = array<i64: 1, 128>}, {pipeline_mode = #tpu.pipeline_mode<synchronous>, transform_indices = @transform_5, window_bounds = array<i64: 128, 128>}, {transform_indices = @transform_6, window_bounds = array<i64: 128, 128>}, {pipeline_mode = #tpu.pipeline_mode<synchronous>, transform_indices = @transform_7, window_bounds = array<i64: 128, 128>}, {pipeline_mode = #tpu.pipeline_mode<synchronous>, transform_indices = @transform_8, window_bounds = array<i64: 128, 128>}, {pipeline_mode = #tpu.pipeline_mode<synchronous>, transform_indices = @transform_9, window_bounds = array<i64: 1, 128>}, {transform_indices = @transform_10, window_bounds = array<i64: 128, 128>}, {transform_indices = @transform_11, window_bounds = array<i64: 128, 128>}]} {
    %c0_i32 = arith.constant 0 : i32
    %0 = arith.cmpi eq, %arg1, %c0_i32 : i32
    %1 = arith.extui %0 : i1 to i32
    %c0_i32_0 = arith.constant 0 : i32
    %2 = arith.cmpi ne, %1, %c0_i32_0 : i32
    scf.if %2 {
      %cst_17 = arith.constant 0.000000e+00 : f32
      %17 = vector.broadcast %cst_17 : f32 to vector<128x128xf32>
      %c0_18 = arith.constant 0 : index
      %c0_19 = arith.constant 0 : index
      %18 = vector.load %arg14[%c0_18, %c0_19] : memref<128x128xf32, #tpu.memory_space<vmem>>, vector<128x128xf32>
      tpu.vector_store %arg14[%c0_18, %c0_19], %17 {strides = array<i32>} : memref<128x128xf32, #tpu.memory_space<vmem>>, vector<128x128xf32>,
      %cst_20 = arith.constant 0.000000e+00 : f32
      %19 = vector.broadcast %cst_20 : f32 to vector<128x128xf32>
      %c0_21 = arith.constant 0 : index
      %c0_22 = arith.constant 0 : index
      %20 = vector.load %arg15[%c0_21, %c0_22] : memref<128x128xf32, #tpu.memory_space<vmem>>, vector<128x128xf32>
      tpu.vector_store %arg15[%c0_21, %c0_22], %19 {strides = array<i32>} : memref<128x128xf32, #tpu.memory_space<vmem>>, vector<128x128xf32>,
    } else {
    }
    %c0 = arith.constant 0 : index
    %c0_1 = arith.constant 0 : index
    %3 = vector.load %arg2[%c0, %c0_1] : memref<128x128xbf16, #tpu.memory_space<vmem>>, vector<128x128xbf16>
    %c0_2 = arith.constant 0 : index
    %c0_3 = arith.constant 0 : index
    %4 = vector.load %arg14[%c0_2, %c0_3] : memref<128x128xf32, #tpu.memory_space<vmem>>, vector<128x128xf32>
    %c0_4 = arith.constant 0 : index
    %c0_5 = arith.constant 0 : index
    %5 = vector.load %arg3[%c0_4, %c0_5] : memref<128x128xbf16, #tpu.memory_space<vmem>>, vector<128x128xbf16>
    %cst = arith.constant dense<0.000000e+00> : vector<128x128xf32>
    %6 = tpu.matmul %3, %5, %cst {dimension_numbers = #tpu.dot_dimension_numbers<[1], [0], [0], [1], [0, 0, 1, 1], [], []>} : vector<128x128xbf16>, vector<128x128xbf16>, vector<128x128xf32> -> vector<128x128xf32>
    %7 = arith.addf %4, %6 : vector<128x128xf32>
    %c0_6 = arith.constant 0 : index
    %c0_7 = arith.constant 0 : index
    %8 = vector.load %arg14[%c0_6, %c0_7] : memref<128x128xf32, #tpu.memory_space<vmem>>, vector<128x128xf32>
    tpu.vector_store %arg14[%c0_6, %c0_7], %7 {strides = array<i32>} : memref<128x128xf32, #tpu.memory_space<vmem>>, vector<128x128xf32>,
    %c0_8 = arith.constant 0 : index
    %c0_9 = arith.constant 0 : index
    %9 = vector.load %arg15[%c0_8, %c0_9] : memref<128x128xf32, #tpu.memory_space<vmem>>, vector<128x128xf32>
    %c0_10 = arith.constant 0 : index
    %c0_11 = arith.constant 0 : index
    %10 = vector.load %arg4[%c0_10, %c0_11] : memref<128x128xbf16, #tpu.memory_space<vmem>>, vector<128x128xbf16>
    %cst_12 = arith.constant dense<0.000000e+00> : vector<128x128xf32>
    %11 = tpu.matmul %3, %10, %cst_12 {dimension_numbers = #tpu.dot_dimension_numbers<[1], [0], [0], [1], [0, 0, 1, 1], [], []>} : vector<128x128xbf16>, vector<128x128xbf16>, vector<128x128xf32> -> vector<128x128xf32>
    %12 = arith.addf %9, %11 : vector<128x128xf32>
    %c0_13 = arith.constant 0 : index
    %c0_14 = arith.constant 0 : index
    %13 = vector.load %arg15[%c0_13, %c0_14] : memref<128x128xf32, #tpu.memory_space<vmem>>, vector<128x128xf32>
    tpu.vector_store %arg15[%c0_13, %c0_14], %12 {strides = array<i32>} : memref<128x128xf32, #tpu.memory_space<vmem>>, vector<128x128xf32>,
    %c0_i32_15 = arith.constant 0 : i32
    %14 = arith.cmpi eq, %arg1, %c0_i32_15 : i32
    %15 = arith.extui %14 : i1 to i32
    %c0_i32_16 = arith.constant 0 : i32
    %16 = arith.cmpi ne, %15, %c0_i32_16 : i32
    scf.if %16 {
      %c0_17 = arith.constant 0 : index
      %c0_18 = arith.constant 0 : index
      %17 = vector.load %arg14[%c0_17, %c0_18] : memref<128x128xf32, #tpu.memory_space<vmem>>, vector<128x128xf32>
      %c0_19 = arith.constant 0 : index
      %c0_20 = arith.constant 0 : index
      %18 = vector.load %arg5[%c0_19, %c0_20] : memref<1x128xf32, #tpu.memory_space<vmem>>, vector<1x128xf32>
      %19 = vector.broadcast %18 : vector<1x128xf32> to vector<128x128xf32>
      %20 = arith.addf %17, %19 : vector<128x128xf32>
      %cst_21 = arith.constant 0.000000e+00 : f32
      %21 = vector.broadcast %cst_21 : f32 to vector<128x128xf32>
      %22 = arith.cmpf ogt, %20, %21 : vector<128x128xf32>
      %cst_22 = arith.constant 1.000000e-01 : f32
      %23 = vector.broadcast %cst_22 : f32 to vector<128x128xf32>
      %24 = arith.mulf %23, %20 : vector<128x128xf32>
      %25 = arith.select %22, %20, %24 : vector<128x128xi1>, vector<128x128xf32>
      %26 = arith.truncf %25 : vector<128x128xf32> to vector<128x128xbf16>
      %c0_23 = arith.constant 0 : index
      %c0_24 = arith.constant 0 : index
      %27 = vector.load %arg7[%c0_23, %c0_24] : memref<128x128xbf16, #tpu.memory_space<vmem>>, vector<128x128xbf16>
      %cst_25 = arith.constant dense<0.000000e+00> : vector<128x128xf32>
      %28 = tpu.matmul %26, %27, %cst_25 {dimension_numbers = #tpu.dot_dimension_numbers<[1], [0], [0], [1], [0, 0, 1, 1], [], []>} : vector<128x128xbf16>, vector<128x128xbf16>, vector<128x128xf32> -> vector<128x128xf32>
      %29 = arith.truncf %28 : vector<128x128xf32> to vector<128x128xbf16>
      %c0_26 = arith.constant 0 : index
      %c0_27 = arith.constant 0 : index
      %30 = vector.load %arg12[%c0_26, %c0_27] : memref<128x128xbf16, #tpu.memory_space<vmem>>, vector<128x128xbf16>
      tpu.vector_store %arg12[%c0_26, %c0_27], %29 {strides = array<i32>} : memref<128x128xbf16, #tpu.memory_space<vmem>>, vector<128x128xbf16>,
      %c0_28 = arith.constant 0 : index
      %c0_29 = arith.constant 0 : index
      %31 = vector.load %arg15[%c0_28, %c0_29] : memref<128x128xf32, #tpu.memory_space<vmem>>, vector<128x128xf32>
      %c0_30 = arith.constant 0 : index
      %c0_31 = arith.constant 0 : index
      %32 = vector.load %arg6[%c0_30, %c0_31] : memref<1x128xf32, #tpu.memory_space<vmem>>, vector<1x128xf32>
      %33 = vector.broadcast %32 : vector<1x128xf32> to vector<128x128xf32>
      %34 = arith.addf %31, %33 : vector<128x128xf32>
      %cst_32 = arith.constant 0.000000e+00 : f32
      %35 = vector.broadcast %cst_32 : f32 to vector<128x128xf32>
      %36 = arith.cmpf ogt, %34, %35 : vector<128x128xf32>
      %cst_33 = arith.constant 1.000000e-01 : f32
      %37 = vector.broadcast %cst_33 : f32 to vector<128x128xf32>
      %38 = arith.mulf %37, %34 : vector<128x128xf32>
      %39 = arith.select %36, %34, %38 : vector<128x128xi1>, vector<128x128xf32>
      %40 = arith.truncf %39 : vector<128x128xf32> to vector<128x128xbf16>
      %c0_34 = arith.constant 0 : index
      %c0_35 = arith.constant 0 : index
      %41 = vector.load %arg9[%c0_34, %c0_35] : memref<128x128xbf16, #tpu.memory_space<vmem>>, vector<128x128xbf16>
      %cst_36 = arith.constant dense<0.000000e+00> : vector<128x128xf32>
      %42 = tpu.matmul %40, %41, %cst_36 {dimension_numbers = #tpu.dot_dimension_numbers<[1], [0], [0], [1], [0, 0, 1, 1], [], []>} : vector<128x128xbf16>, vector<128x128xbf16>, vector<128x128xf32> -> vector<128x128xf32>
      %c0_37 = arith.constant 0 : index
      %c0_38 = arith.constant 0 : index
      %43 = vector.load %arg8[%c0_37, %c0_38] : memref<128x128xbf16, #tpu.memory_space<vmem>>, vector<128x128xbf16>
      %c0_39 = arith.constant 0 : index
      %c0_40 = arith.constant 0 : index
      %44 = vector.load %arg10[%c0_39, %c0_40] : memref<128x128xbf16, #tpu.memory_space<vmem>>, vector<128x128xbf16>
      %cst_41 = arith.constant dense<0.000000e+00> : vector<128x128xf32>
      %45 = tpu.matmul %43, %44, %cst_41 {dimension_numbers = #tpu.dot_dimension_numbers<[1], [0], [0], [1], [0, 0, 1, 1], [], []>} : vector<128x128xbf16>, vector<128x128xbf16>, vector<128x128xf32> -> vector<128x128xf32>
      %46 = arith.addf %42, %45 : vector<128x128xf32>
      %c0_42 = arith.constant 0 : index
      %c0_43 = arith.constant 0 : index
      %47 = vector.load %arg11[%c0_42, %c0_43] : memref<1x128xf32, #tpu.memory_space<vmem>>, vector<1x128xf32>
      %48 = vector.broadcast %47 : vector<1x128xf32> to vector<128x128xf32>
      %49 = arith.addf %46, %48 : vector<128x128xf32>
      %cst_44 = arith.constant 0.000000e+00 : f32
      %50 = vector.broadcast %cst_44 : f32 to vector<128x128xf32>
      %51 = arith.maximumf %49, %50 : vector<128x128xf32>
      %c0_45 = arith.constant 0 : index
      %c0_46 = arith.constant 0 : index
      %52 = vector.load %arg13[%c0_45, %c0_46] : memref<128x128xf32, #tpu.memory_space<vmem>>, vector<128x128xf32>
      tpu.vector_store %arg13[%c0_45, %c0_46], %51 {strides = array<i32>} : memref<128x128xf32, #tpu.memory_space<vmem>>, vector<128x128xf32>,
    } else {
    }
    return
  }
  func.func @transform_0(%arg0: i32, %arg1: i32) -> (i32, i32) {
    %c0_i32 = arith.constant 0 : i32
    return %arg0, %arg1 : i32, i32
  }
  func.func @transform_1(%arg0: i32, %arg1: i32) -> (i32, i32) {
    %c0_i32 = arith.constant 0 : i32
    %c0_i32_0 = arith.constant 0 : i32
    return %arg1, %c0_i32 : i32, i32
  }
  func.func @transform_2(%arg0: i32, %arg1: i32) -> (i32, i32) {
    %c0_i32 = arith.constant 0 : i32
    %c0_i32_0 = arith.constant 0 : i32
    return %arg1, %c0_i32 : i32, i32
  }
  func.func @transform_3(%arg0: i32, %arg1: i32) -> (i32, i32) {
    %c0_i32 = arith.constant 0 : i32
    %c0_i32_0 = arith.constant 0 : i32
    %c0_i32_1 = arith.constant 0 : i32
    return %c0_i32, %c0_i32_0 : i32, i32
  }
  func.func @transform_4(%arg0: i32, %arg1: i32) -> (i32, i32) {
    %c0_i32 = arith.constant 0 : i32
    %c0_i32_0 = arith.constant 0 : i32
    %c0_i32_1 = arith.constant 0 : i32
    return %c0_i32, %c0_i32_0 : i32, i32
  }
  func.func @transform_5(%arg0: i32, %arg1: i32) -> (i32, i32) {
    %c0_i32 = arith.constant 0 : i32
    %c0_i32_0 = arith.constant 0 : i32
    %c0_i32_1 = arith.constant 0 : i32
    return %c0_i32, %c0_i32_0 : i32, i32
  }
  func.func @transform_6(%arg0: i32, %arg1: i32) -> (i32, i32) {
    %c0_i32 = arith.constant 0 : i32
    %c0_i32_0 = arith.constant 0 : i32
    return %arg0, %c0_i32 : i32, i32
  }
  func.func @transform_7(%arg0: i32, %arg1: i32) -> (i32, i32) {
    %c0_i32 = arith.constant 0 : i32
    %c0_i32_0 = arith.constant 0 : i32
    %c0_i32_1 = arith.constant 0 : i32
    return %c0_i32, %c0_i32_0 : i32, i32
  }
  func.func @transform_8(%arg0: i32, %arg1: i32) -> (i32, i32) {
    %c0_i32 = arith.constant 0 : i32
    %c0_i32_0 = arith.constant 0 : i32
    %c0_i32_1 = arith.constant 0 : i32
    return %c0_i32, %c0_i32_0 : i32, i32
  }
  func.func @transform_9(%arg0: i32, %arg1: i32) -> (i32, i32) {
    %c0_i32 = arith.constant 0 : i32
    %c0_i32_0 = arith.constant 0 : i32
    %c0_i32_1 = arith.constant 0 : i32
    return %c0_i32, %c0_i32_0 : i32, i32
  }
  func.func @transform_10(%arg0: i32, %arg1: i32) -> (i32, i32) {
    %c0_i32 = arith.constant 0 : i32
    %c0_i32_0 = arith.constant 0 : i32
    return %arg0, %c0_i32 : i32, i32
  }
  func.func @transform_11(%arg0: i32, %arg1: i32) -> (i32, i32) {
    %c0_i32 = arith.constant 0 : i32
    %c0_i32_0 = arith.constant 0 : i32
    return %arg0, %c0_i32 : i32, i32
  }
}

</mosaic_0001>

<bundles_post_ra>
// kernel: gnn_forward.3
= control target key start
LH: loop header
LB: loop body
LE: loop exit
PB: predicated region body
PF: predicated region fallthrough
CT: control target
= control target key end

     0   :  { %s832_s1 = inlined_call_operand.vmem [shape: bf16[128,128], index: 1, kind: input, shape index: {}]   ;;  %s833_s2 = inlined_call_operand.vmem [shape: f32[1,128], index: 2, kind: input, shape index: {}]   ;;  %s834_s0 = inlined_call_operand.vmem [shape: bf16[128,128], index: 0, kind: input, shape index: {}]   ;;  %s835_s3 = inlined_call_operand.vmem [shape: bf16[128,128], index: 3, kind: input, shape index: {}]   ;;  %s836_s4 = inlined_call_operand.vmem [shape: bf16[128,128], index: 4, kind: output, shape index: {}]  }
   0x1   :  { %v617_v0 = vld [vmem:[%s832_s1 + $0x38] sm:$0xff]  ;;  %v616_v1 = vld [vmem:[%s832_s1 + $0x30] sm:$0xff]  ;;  %v615_v2 = vld [vmem:[%s832_s1 + $0x28] sm:$0xff] }
   0x2   :  { %181 = vmatpush.bf16.msra.mxu0 %v617_v0  ;;  %673 = vmatpush.bf16.msra.mxu2 %v617_v0  ;;  %v614_v3 = vld [vmem:[%s832_s1 + $0x20] sm:$0xff]  ;;  %v613_v4 = vld [vmem:[%s832_s1 + $0x18] sm:$0xff]  ;;  %v612_v5 = vld [vmem:[%s832_s1 + $0x10] sm:$0xff] }
   0x3   :  { %v611_v6 = vld [vmem:[%s832_s1 + $0x8] sm:$0xff]  ;;  %v610_v7 = vld [vmem:[%s832_s1] sm:$0xff]  ;;  %v625_v12 = vld [vmem:[%s835_s3 + $0x38] sm:$0xff] }
   0x4   :  { %v602_v8 = vld [vmem:[%s834_s0] sm:$0xff]  ;;  %v603_v10 = vld [vmem:[%s834_s0 + $0x8] sm:$0xff]  ;;  %421 = vmatpush.bf16.msra.mxu1 %v625_v12  ;;  %v624_v13 = vld [vmem:[%s835_s3 + $0x30] sm:$0xff]  ;;  %681 = vmatpush.bf16.msra.mxu3 %v625_v12 }
   0x5   :  { %v606_v9 = vld [vmem:[%s834_s0 + $0x20] sm:$0xff]  ;;  %v607_v11 = vld [vmem:[%s834_s0 + $0x28] sm:$0xff]  ;;  %v604_v16 = vld [vmem:[%s834_s0 + $0x10] sm:$0xff] }
   0x6   :  { %182 = vmatpush.bf16.msra.mxu0 %v616_v1  ;;  %674 = vmatpush.bf16.msra.mxu2 %v616_v1  ;;  %v623_v14 = vld [vmem:[%s835_s3 + $0x28] sm:$0xff]  ;;  %v622_v15 = vld [vmem:[%s835_s3 + $0x20] sm:$0xff]  ;;  %v608_v17 = vld [vmem:[%s834_s0 + $0x30] sm:$0xff] }
   0x7   :  { %v605_v18 = vld [vmem:[%s834_s0 + $0x18] sm:$0xff]  ;;  %v620_v21 = vld [vmem:[%s835_s3 + $0x10] sm:$0xff]  ;;  %v619_v22 = vld [vmem:[%s835_s3 + $0x8] sm:$0xff] }
   0x8   :  { %422 = vmatpush.bf16.msra.mxu1 %v624_v13  ;;  %682 = vmatpush.bf16.msra.mxu3 %v624_v13  ;;  %v609_v19 = vld [vmem:[%s834_s0 + $0x38] sm:$0xff]  ;;  %v618_v23 = vld [vmem:[%s835_s3] sm:$0xff] }
   0x9   :  { %v621_v20 = vld [vmem:[%s835_s3 + $0x18] sm:$0xff]  ;;  %v790_v25 = vld [vmem:[%s833_s2] ss:$0 sm:$0xff] }
   0xa   :  { %183 = vmatpush.bf16.msra.mxu0 %v615_v2  ;;  %675 = vmatpush.bf16.msra.mxu2 %v615_v2 }
   0xc   :  { %423 = vmatpush.bf16.msra.mxu1 %v623_v14  ;;  %683 = vmatpush.bf16.msra.mxu3 %v623_v14 }
   0xe   :  { %184 = vmatpush.bf16.msra.mxu0 %v614_v3  ;;  %676 = vmatpush.bf16.msra.mxu2 %v614_v3 }
  0x10   :  { %424 = vmatpush.bf16.msra.mxu1 %v622_v15  ;;  %684 = vmatpush.bf16.msra.mxu3 %v622_v15 }
  0x12   :  { %185 = vmatpush.bf16.msra.mxu0 %v613_v4  ;;  %677 = vmatpush.bf16.msra.mxu2 %v613_v4 }
  0x14   :  { %425 = vmatpush.bf16.msra.mxu1 %v621_v20  ;;  %685 = vmatpush.bf16.msra.mxu3 %v621_v20 }
  0x16   :  { %186 = vmatpush.bf16.msra.mxu0 %v612_v5  ;;  %678 = vmatpush.bf16.msra.mxu2 %v612_v5 }
  0x18   :  { %426 = vmatpush.bf16.msra.mxu1 %v620_v21  ;;  %686 = vmatpush.bf16.msra.mxu3 %v620_v21 }
  0x1a   :  { %187 = vmatpush.bf16.msra.mxu0 %v611_v6  ;;  %679 = vmatpush.bf16.msra.mxu2 %v611_v6 }
  0x1c   :  { %427 = vmatpush.bf16.msra.mxu1 %v619_v22  ;;  %687 = vmatpush.bf16.msra.mxu3 %v619_v22 }
  0x1e   :  { %188 = vmatpush.bf16.msra.mxu0 %v610_v7  ;;  %680 = vmatpush.bf16.msra.mxu2 %v610_v7 }
  0x20   :  { %428 = vmatpush.bf16.msra.mxu1 %v618_v23  ;;  %688 = vmatpush.bf16.msra.mxu3 %v618_v23 }
  0x21   :  { %189 = vmatmul.bf16.vlgmr.msra.gmra.mxu0 %v602_v8  ;;  %209 = vmatmul.bf16.vlgmr.msra.gmra.mxu2 %v606_v9 }
  0x31   :  { %194 = vmatmul.bf16.gmra.mxu0 %v603_v10  ;;  %214 = vmatmul.bf16.gmra.mxu2 %v607_v11 }
  0x41   :  { %199 = vmatmul.bf16.gmra.mxu0 %v604_v16  ;;  %219 = vmatmul.bf16.gmra.mxu2 %v608_v17 }
  0x51   :  { %204 = vmatmul.bf16.gmra.mxu0 %v605_v18  ;;  %224 = vmatmul.bf16.gmra.mxu2 %v609_v19 }
  0x9e   :  { %v190_v24 = vpop.f32.mrf.mxu0 }
  0x9f   :  { %v285_v26 = vadd.f32 %v790_v25, %v190_v24 }
  0xa1   :  { %v317_v28 = vmul.f32 0.1, %v285_v26  ;;  %vm301_vm0 = vcmp.gt.f32.partialorder %v285_v26, 0.0 }
  0xa3   :  { %v333_v33 = vsel %vm301_vm0, %v285_v26, %v317_v28 }
  0xa4   :  { %v210_v27 = vpop.f32.mrf.mxu2 }
  0xa5   :  { %v293_v31 = vadd.f32 %v790_v25, %v210_v27 }
  0xa6   :  { %v192_v29 = vpop.f32.mrf.mxu0 }
  0xa7   :  { %v286_v30 = vadd.f32 %v790_v25, %v192_v29  ;;  %v325_v37 = vmul.f32 0.1, %v293_v31  ;;  %vm309_vm2 = vcmp.gt.f32.partialorder %v293_v31, 0.0 }
  0xa9   :  { %v318_v32 = vmul.f32 0.1, %v286_v30  ;;  %vm302_vm1 = vcmp.gt.f32.partialorder %v286_v30, 0.0  ;;  %v341_v42 = vsel %vm309_vm2, %v293_v31, %v325_v37 }
  0xab   :  { %v334_v34 = vsel %vm302_vm1, %v286_v30, %v318_v32 }
  0xac   :  { %v212_v35 = vpop.f32.mrf.mxu2  ;;  %v349_v36 = vpack.c.bf16 %v334_v34, %v333_v33 }
  0xad   :  { %v294_v38 = vadd.f32 %v790_v25, %v212_v35 }
  0xae   :  { %v195_v39 = vpop.f32.mrf.mxu0  ;;  %429 = vmatmul.bf16.vlgmr.msra.gmra.mxu1 %v349_v36 }
  0xaf   :  { %v326_v40 = vmul.f32 0.1, %v294_v38  ;;  %vm310_vm3 = vcmp.gt.f32.partialorder %v294_v38, 0.0  ;;  %v287_v41 = vadd.f32 %v790_v25, %v195_v39 }
  0xb1   :  { %v342_v43 = vsel %vm310_vm3, %v294_v38, %v326_v40  ;;  %v319_v46 = vmul.f32 0.1, %v287_v41  ;;  %vm303_vm4 = vcmp.gt.f32.partialorder %v287_v41, 0.0 }
  0xb2   :  { %v353_v44 = vpack.c.bf16 %v342_v43, %v341_v42 }
  0xb3   :  { %v335_v51 = vsel %vm303_vm4, %v287_v41, %v319_v46 }
  0xb4   :  { %v215_v45 = vpop.f32.mrf.mxu2  ;;  %449 = vmatmul.bf16.vlgmr.msra.gmra.mxu3 %v353_v44 }
  0xb5   :  { %v295_v49 = vadd.f32 %v790_v25, %v215_v45 }
  0xb6   :  { %v197_v47 = vpop.f32.mrf.mxu0 }
  0xb7   :  { %v288_v48 = vadd.f32 %v790_v25, %v197_v47  ;;  %v327_v55 = vmul.f32 0.1, %v295_v49  ;;  %vm311_vm6 = vcmp.gt.f32.partialorder %v295_v49, 0.0 }
  0xb9   :  { %v320_v50 = vmul.f32 0.1, %v288_v48  ;;  %vm304_vm5 = vcmp.gt.f32.partialorder %v288_v48, 0.0  ;;  %v343_v60 = vsel %vm311_vm6, %v295_v49, %v327_v55 }
  0xbb   :  { %v336_v52 = vsel %vm304_vm5, %v288_v48, %v320_v50 }
  0xbc   :  { %v217_v53 = vpop.f32.mrf.mxu2  ;;  %v350_v54 = vpack.c.bf16 %v336_v52, %v335_v51 }
  0xbd   :  { %v296_v56 = vadd.f32 %v790_v25, %v217_v53 }
  0xbe   :  { %v200_v57 = vpop.f32.mrf.mxu0  ;;  %434 = vmatmul.bf16.gmra.mxu1 %v350_v54 }
  0xbf   :  { %v328_v58 = vmul.f32 0.1, %v296_v56  ;;  %vm312_vm7 = vcmp.gt.f32.partialorder %v296_v56, 0.0  ;;  %v289_v59 = vadd.f32 %v790_v25, %v200_v57 }
  0xc1   :  { %v344_v61 = vsel %vm312_vm7, %v296_v56, %v328_v58  ;;  %v321_v0 = vmul.f32 0.1, %v289_v59  ;;  %vm305_vm8 = vcmp.gt.f32.partialorder %v289_v59, 0.0 }
  0xc2   :  { %v354_v62 = vpack.c.bf16 %v344_v61, %v343_v60 }
  0xc3   :  { %v337_v5 = vsel %vm305_vm8, %v289_v59, %v321_v0 }
  0xc4   :  { %v220_v63 = vpop.f32.mrf.mxu2  ;;  %454 = vmatmul.bf16.gmra.mxu3 %v354_v62 }
  0xc5   :  { %v297_v3 = vadd.f32 %v790_v25, %v220_v63 }
  0xc6   :  { %v202_v1 = vpop.f32.mrf.mxu0 }
  0xc7   :  { %v290_v2 = vadd.f32 %v790_v25, %v202_v1  ;;  %v329_v9 = vmul.f32 0.1, %v297_v3  ;;  %vm313_vm10 = vcmp.gt.f32.partialorder %v297_v3, 0.0 }
  0xc9   :  { %v322_v4 = vmul.f32 0.1, %v290_v2  ;;  %vm306_vm9 = vcmp.gt.f32.partialorder %v290_v2, 0.0  ;;  %v345_v14 = vsel %vm313_vm10, %v297_v3, %v329_v9 }
  0xcb   :  { %v338_v6 = vsel %vm306_vm9, %v290_v2, %v322_v4 }
  0xcc   :  { %v222_v7 = vpop.f32.mrf.mxu2  ;;  %v351_v8 = vpack.c.bf16 %v338_v6, %v337_v5 }
  0xcd   :  { %v298_v10 = vadd.f32 %v790_v25, %v222_v7 }
  0xce   :  { %v205_v11 = vpop.f32.mrf.mxu0  ;;  %439 = vmatmul.bf16.gmra.mxu1 %v351_v8 }
  0xcf   :  { %v330_v12 = vmul.f32 0.1, %v298_v10  ;;  %vm314_vm11 = vcmp.gt.f32.partialorder %v298_v10, 0.0  ;;  %v291_v13 = vadd.f32 %v790_v25, %v205_v11 }
  0xd1   :  { %v346_v15 = vsel %vm314_vm11, %v298_v10, %v330_v12  ;;  %v323_v18 = vmul.f32 0.1, %v291_v13  ;;  %vm307_vm12 = vcmp.gt.f32.partialorder %v291_v13, 0.0 }
  0xd2   :  { %v355_v16 = vpack.c.bf16 %v346_v15, %v345_v14 }
  0xd3   :  { %v339_v23 = vsel %vm307_vm12, %v291_v13, %v323_v18 }
  0xd4   :  { %v225_v17 = vpop.f32.mrf.mxu2  ;;  %459 = vmatmul.bf16.gmra.mxu3 %v355_v16 }
  0xd5   :  { %v299_v21 = vadd.f32 %v790_v25, %v225_v17 }
  0xd6   :  { %v207_v19 = vpop.f32.mrf.mxu0 }
  0xd7   :  { %v292_v20 = vadd.f32 %v790_v25, %v207_v19  ;;  %v331_v28 = vmul.f32 0.1, %v299_v21  ;;  %vm315_vm14 = vcmp.gt.f32.partialorder %v299_v21, 0.0 }
  0xd9   :  { %v324_v22 = vmul.f32 0.1, %v292_v20  ;;  %vm308_vm13 = vcmp.gt.f32.partialorder %v292_v20, 0.0  ;;  %v347_v31 = vsel %vm315_vm14, %v299_v21, %v331_v28 }
  0xdb   :  { %v340_v24 = vsel %vm308_vm13, %v292_v20, %v324_v22 }
  0xdc   :  { %v227_v26 = vpop.f32.mrf.mxu2  ;;  %v352_v27 = vpack.c.bf16 %v340_v24, %v339_v23 }
  0xdd   :  { %v300_v29 = vadd.f32 %v790_v25, %v227_v26 }
  0xde   :  { %444 = vmatmul.bf16.gmra.mxu1 %v352_v27 }
  0xdf   :  { %v332_v30 = vmul.f32 0.1, %v300_v29  ;;  %vm316_vm15 = vcmp.gt.f32.partialorder %v300_v29, 0.0 }
  0xe1   :  { %v348_v32 = vsel %vm316_vm15, %v300_v29, %v332_v30 }
  0xe2   :  { %v356_v33 = vpack.c.bf16 %v348_v32, %v347_v31 }
  0xe4   :  { %464 = vmatmul.bf16.gmra.mxu3 %v356_v33 }
 0x12b   :  { %v430_v34 = vpop.f32.mrf.mxu1 }
 0x133   :  { %v432_v35 = vpop.f32.mrf.mxu1 }
 0x134   :  { %v629_v36 = vpack.c.bf16 %v432_v35, %v430_v34 }
 0x136   :  { %630 = vst [vmem:[%s836_s4] sm:$0xff] %v629_v36  }
 0x137   :  { %v450_v37 = vpop.f32.mrf.mxu3 }
 0x13b   :  { %v435_v38 = vpop.f32.mrf.mxu1 }
 0x13f   :  { %v452_v39 = vpop.f32.mrf.mxu3 }
 0x140   :  { %v649_v40 = vpack.c.bf16 %v452_v39, %v450_v37 }
 0x142   :  { %669 = vst [vmem:[%s836_s4 + $0x20] sm:$0xff] %v649_v40  }
 0x143   :  { %v437_v25 = vpop.f32.mrf.mxu1 }
 0x144   :  { %v634_v41 = vpack.c.bf16 %v437_v25, %v435_v38 }
 0x146   :  { %666 = vst [vmem:[%s836_s4 + $0x8] sm:$0xff] %v634_v41  }
 0x147   :  { %v455_v42 = vpop.f32.mrf.mxu3 }
 0x14b   :  { %v440_v43 = vpop.f32.mrf.mxu1 }
 0x14f   :  { %v457_v44 = vpop.f32.mrf.mxu3 }
 0x150   :  { %v654_v45 = vpack.c.bf16 %v457_v44, %v455_v42 }
 0x152   :  { %670 = vst [vmem:[%s836_s4 + $0x28] sm:$0xff] %v654_v45  }
 0x153   :  { %v442_v46 = vpop.f32.mrf.mxu1 }
 0x154   :  { %v639_v47 = vpack.c.bf16 %v442_v46, %v440_v43 }
 0x156   :  { %667 = vst [vmem:[%s836_s4 + $0x10] sm:$0xff] %v639_v47  }
 0x157   :  { %v460_v48 = vpop.f32.mrf.mxu3 }
 0x15b   :  { %v445_v49 = vpop.f32.mrf.mxu1 }
 0x15f   :  { %v462_v50 = vpop.f32.mrf.mxu3 }
 0x160   :  { %v659_v51 = vpack.c.bf16 %v462_v50, %v460_v48 }
 0x162   :  { %671 = vst [vmem:[%s836_s4 + $0x30] sm:$0xff] %v659_v51  }
 0x163   :  { %v447_v52 = vpop.f32.mrf.mxu1 }
 0x164   :  { %v644_v53 = vpack.c.bf16 %v447_v52, %v445_v49 }
 0x166   :  { %668 = vst [vmem:[%s836_s4 + $0x18] sm:$0xff] %v644_v53  }
 0x167   :  { %v465_v54 = vpop.f32.mrf.mxu3 }
 0x16f   :  { %v467_v55 = vpop.f32.mrf.mxu3 }
 0x170   :  { %v664_v56 = vpack.c.bf16 %v467_v55, %v465_v54 }
 0x172   :  { %672 = vst [vmem:[%s836_s4 + $0x38] sm:$0xff] %v664_v56  }

// kernel: gnn_forward.5
= control target key start
LH: loop header
LB: loop body
LE: loop exit
PB: predicated region body
PF: predicated region fallthrough
CT: control target
= control target key end

     0   :  { %s1188_s1 = inlined_call_operand.vmem [shape: bf16[128,128], index: 1, kind: input, shape index: {}]   ;;  %s1189_s2 = inlined_call_operand.vmem [shape: f32[1,128], index: 2, kind: input, shape index: {}]   ;;  %s1190_s0 = inlined_call_operand.vmem [shape: bf16[128,128], index: 0, kind: input, shape index: {}]   ;;  %s1191_s5 = inlined_call_operand.vmem [shape: bf16[128,128], index: 5, kind: input, shape index: {}]   ;;  %s1192_s4 = inlined_call_operand.vmem [shape: bf16[128,128], index: 4, kind: input, shape index: {}]   ;;  %s1193_s3 = inlined_call_operand.vmem [shape: bf16[128,128], index: 3, kind: input, shape index: {}]   ;;  %s1194_s6 = inlined_call_operand.vmem [shape: f32[1,128], index: 6, kind: input, shape index: {}]   ;;  %s1195_s7 = inlined_call_operand.vmem [shape: f32[128,128], index: 7, kind: output, shape index: {}]  }
   0x1   :  { %v887_v0 = vld [vmem:[%s1188_s1 + $0x38] sm:$0xff]  ;;  %v886_v1 = vld [vmem:[%s1188_s1 + $0x30] sm:$0xff]  ;;  %v885_v2 = vld [vmem:[%s1188_s1 + $0x28] sm:$0xff] }
   0x2   :  { %190 = vmatpush.bf16.msra.mxu0 %v887_v0  ;;  %912 = vmatpush.bf16.msra.mxu3 %v887_v0  ;;  %v884_v3 = vld [vmem:[%s1188_s1 + $0x20] sm:$0xff]  ;;  %v883_v4 = vld [vmem:[%s1188_s1 + $0x18] sm:$0xff]  ;;  %v882_v5 = vld [vmem:[%s1188_s1 + $0x10] sm:$0xff] }
   0x3   :  { %v881_v6 = vld [vmem:[%s1188_s1 + $0x8] sm:$0xff]  ;;  %v880_v7 = vld [vmem:[%s1188_s1] sm:$0xff]  ;;  %v878_v9 = vld [vmem:[%s1190_s0 + $0x30] sm:$0xff] }
   0x4   :  { %v872_v8 = vld [vmem:[%s1190_s0] sm:$0xff]  ;;  %v873_v10 = vld [vmem:[%s1190_s0 + $0x8] sm:$0xff]  ;;  %v879_v11 = vld [vmem:[%s1190_s0 + $0x38] sm:$0xff] }
   0x5   :  { %v874_v12 = vld [vmem:[%s1190_s0 + $0x10] sm:$0xff]  ;;  %v875_v13 = vld [vmem:[%s1190_s0 + $0x18] sm:$0xff]  ;;  %v909_v18 = vld [vmem:[%s1191_s5 + $0x28] sm:$0xff] }
   0x6   :  { %191 = vmatpush.bf16.msra.mxu0 %v886_v1  ;;  %913 = vmatpush.bf16.msra.mxu3 %v886_v1  ;;  %v911_v14 = vld [vmem:[%s1191_s5 + $0x38] sm:$0xff]  ;;  %v910_v16 = vld [vmem:[%s1191_s5 + $0x30] sm:$0xff]  ;;  %v893_v19 = vld [vmem:[%s1192_s4 + $0x28] sm:$0xff] }
   0x7   :  { %v895_v15 = vld [vmem:[%s1192_s4 + $0x38] sm:$0xff]  ;;  %510 = vmatpush.bf16.msra.mxu1 %v911_v14  ;;  %v894_v17 = vld [vmem:[%s1192_s4 + $0x30] sm:$0xff]  ;;  %v908_v20 = vld [vmem:[%s1191_s5 + $0x20] sm:$0xff] }
   0x8   :  { %607 = vmatpush.bf16.msra.mxu2 %v895_v15  ;;  %v892_v21 = vld [vmem:[%s1192_s4 + $0x20] sm:$0xff]  ;;  %v907_v23 = vld [vmem:[%s1191_s5 + $0x18] sm:$0xff]  ;;  %v906_v24 = vld [vmem:[%s1191_s5 + $0x10] sm:$0xff] }
   0x9   :  { %v876_v22 = vld [vmem:[%s1190_s0 + $0x20] sm:$0xff]  ;;  %v877_v25 = vld [vmem:[%s1190_s0 + $0x28] sm:$0xff]  ;;  %v891_v27 = vld [vmem:[%s1192_s4 + $0x18] sm:$0xff] }
   0xa   :  { %192 = vmatpush.bf16.msra.mxu0 %v885_v2  ;;  %914 = vmatpush.bf16.msra.mxu3 %v885_v2  ;;  %v905_v26 = vld [vmem:[%s1191_s5 + $0x8] sm:$0xff]  ;;  %v904_v28 = vld [vmem:[%s1191_s5] sm:$0xff]  ;;  %v890_v29 = vld [vmem:[%s1192_s4 + $0x10] sm:$0xff] }
   0xb   :  { %511 = vmatpush.bf16.msra.mxu1 %v910_v16  ;;  %v902_v30 = vld [vmem:[%s1193_s3 + $0x30] sm:$0xff]  ;;  %v889_v31 = vld [vmem:[%s1192_s4 + $0x8] sm:$0xff]  ;;  %v888_v32 = vld [vmem:[%s1192_s4] sm:$0xff] }
   0xc   :  { %608 = vmatpush.bf16.msra.mxu2 %v894_v17  ;;  %v896_v33 = vld [vmem:[%s1193_s3] sm:$0xff]  ;;  %v903_v34 = vld [vmem:[%s1193_s3 + $0x38] sm:$0xff]  ;;  %v897_v35 = vld [vmem:[%s1193_s3 + $0x8] sm:$0xff] }
   0xd   :  { %v1089_v37 = vld [vmem:[%s1189_s2] ss:$0 sm:$0xff]  ;;  %v898_v45 = vld [vmem:[%s1193_s3 + $0x10] sm:$0xff]  ;;  %v899_v0 = vld [vmem:[%s1193_s3 + $0x18] sm:$0xff] }
   0xe   :  { %193 = vmatpush.bf16.msra.mxu0 %v884_v3  ;;  %915 = vmatpush.bf16.msra.mxu3 %v884_v3 }
   0xf   :  { %512 = vmatpush.bf16.msra.mxu1 %v909_v18 }
  0x10   :  { %609 = vmatpush.bf16.msra.mxu2 %v893_v19 }
  0x12   :  { %194 = vmatpush.bf16.msra.mxu0 %v883_v4  ;;  %916 = vmatpush.bf16.msra.mxu3 %v883_v4 }
  0x13   :  { %513 = vmatpush.bf16.msra.mxu1 %v908_v20 }
  0x14   :  { %610 = vmatpush.bf16.msra.mxu2 %v892_v21 }
  0x16   :  { %195 = vmatpush.bf16.msra.mxu0 %v882_v5  ;;  %917 = vmatpush.bf16.msra.mxu3 %v882_v5 }
  0x17   :  { %514 = vmatpush.bf16.msra.mxu1 %v907_v23 }
  0x18   :  { %611 = vmatpush.bf16.msra.mxu2 %v891_v27 }
  0x1a   :  { %196 = vmatpush.bf16.msra.mxu0 %v881_v6  ;;  %918 = vmatpush.bf16.msra.mxu3 %v881_v6 }
  0x1b   :  { %515 = vmatpush.bf16.msra.mxu1 %v906_v24 }
  0x1c   :  { %612 = vmatpush.bf16.msra.mxu2 %v890_v29 }
  0x1e   :  { %197 = vmatpush.bf16.msra.mxu0 %v880_v7  ;;  %919 = vmatpush.bf16.msra.mxu3 %v880_v7 }
  0x1f   :  { %516 = vmatpush.bf16.msra.mxu1 %v905_v26 }
  0x20   :  { %613 = vmatpush.bf16.msra.mxu2 %v889_v31 }
  0x21   :  { %198 = vmatmul.bf16.vlgmr.msra.gmra.mxu0 %v872_v8  ;;  %228 = vmatmul.bf16.vlgmr.msra.gmra.mxu3 %v878_v9 }
  0x22   :  { %920 = vmatpush.bf16.msrb.mxu3 %v911_v14 }
  0x23   :  { %517 = vmatpush.bf16.msra.mxu1 %v904_v28 }
  0x24   :  { %614 = vmatpush.bf16.msra.mxu2 %v888_v32 }
  0x26   :  { %921 = vmatpush.bf16.msrb.mxu3 %v910_v16  ;;  %518 = vmatmul.bf16.vlgmr.msra.gmra.mxu1 %v896_v33 }
  0x2a   :  { %922 = vmatpush.bf16.msrb.mxu3 %v909_v18 }
  0x2e   :  { %923 = vmatpush.bf16.msrb.mxu3 %v908_v20 }
  0x31   :  { %203 = vmatmul.bf16.gmra.mxu0 %v873_v10  ;;  %233 = vmatmul.bf16.gmra.mxu3 %v879_v11 }
  0x32   :  { %924 = vmatpush.bf16.msrb.mxu3 %v907_v23 }
  0x36   :  { %925 = vmatpush.bf16.msrb.mxu3 %v906_v24  ;;  %523 = vmatmul.bf16.gmra.mxu1 %v897_v35 }
  0x3a   :  { %926 = vmatpush.bf16.msrb.mxu3 %v905_v26 }
  0x3e   :  { %927 = vmatpush.bf16.msrb.mxu3 %v904_v28 }
  0x41   :  { %208 = vmatmul.bf16.gmra.mxu0 %v874_v12  ;;  %548 = vmatmul.bf16.vlgmr.msrb.gmra.mxu3 %v902_v30 }
  0x42   :  { %928 = vmatpush.bf16.msra.mxu3 %v895_v15 }
  0x46   :  { %929 = vmatpush.bf16.msra.mxu3 %v894_v17  ;;  %528 = vmatmul.bf16.gmra.mxu1 %v898_v45  ;;  %v900_v17 = vld [vmem:[%s1193_s3 + $0x20] sm:$0xff] }
  0x4a   :  { %930 = vmatpush.bf16.msra.mxu3 %v893_v19 }
  0x4e   :  { %931 = vmatpush.bf16.msra.mxu3 %v892_v21 }
  0x51   :  { %213 = vmatmul.bf16.gmra.mxu0 %v875_v13  ;;  %553 = vmatmul.bf16.gmra.mxu3 %v903_v34 }
  0x52   :  { %932 = vmatpush.bf16.msra.mxu3 %v891_v27  ;;  %v901_v27 = vld [vmem:[%s1193_s3 + $0x28] sm:$0xff] }
  0x56   :  { %933 = vmatpush.bf16.msra.mxu3 %v890_v29  ;;  %533 = vmatmul.bf16.gmra.mxu1 %v899_v0 }
  0x5a   :  { %934 = vmatpush.bf16.msra.mxu3 %v889_v31 }
  0x5e   :  { %935 = vmatpush.bf16.msra.mxu3 %v888_v32 }
  0x61   :  { %218 = vmatmul.bf16.gmra.mxu0 %v876_v22 }
  0x66   :  { %538 = vmatmul.bf16.gmra.mxu1 %v900_v17 }
  0x71   :  { %223 = vmatmul.bf16.gmra.mxu0 %v877_v25 }
  0x76   :  { %543 = vmatmul.bf16.gmra.mxu1 %v901_v27 }
  0x9e   :  { %v199_v36 = vpop.f32.mrf.mxu0 }
  0x9f   :  { %v294_v38 = vadd.f32 %v1089_v37, %v199_v36 }
  0xa1   :  { %v326_v41 = vmul.f32 0.1, %v294_v38  ;;  %vm310_vm0 = vcmp.gt.f32.partialorder %v294_v38, 0.0 }
  0xa3   :  { %v342_v46 = vsel %vm310_vm0, %v294_v38, %v326_v41 }
  0xa4   :  { %v229_v39 = vpop.f32.mrf.mxu3 }
  0xa5   :  { %v306_v43 = vadd.f32 %v1089_v37, %v229_v39 }
  0xa6   :  { %v201_v40 = vpop.f32.mrf.mxu0 }
  0xa7   :  { %v295_v42 = vadd.f32 %v1089_v37, %v201_v40  ;;  %v338_v48 = vmul.f32 0.1, %v306_v43  ;;  %vm322_vm2 = vcmp.gt.f32.partialorder %v306_v43, 0.0 }
  0xa9   :  { %v327_v44 = vmul.f32 0.1, %v295_v42  ;;  %vm311_vm1 = vcmp.gt.f32.partialorder %v295_v42, 0.0  ;;  %v354_v53 = vsel %vm322_vm2, %v306_v43, %v338_v48 }
  0xab   :  { %v343_v47 = vsel %vm311_vm1, %v295_v42, %v327_v44 }
  0xac   :  { %v358_v49 = vpack.c.bf16 %v343_v47, %v342_v46  ;;  %v231_v50 = vpop.f32.mrf.mxu3 }
  0xad   :  { %v307_v51 = vadd.f32 %v1089_v37, %v231_v50 }
  0xae   :  { %v204_v52 = vpop.f32.mrf.mxu0  ;;  %615 = vmatmul.bf16.vlgmr.msra.gmra.mxu2 %v358_v49 }
  0xaf   :  { %vm323_vm3 = vcmp.gt.f32.partialorder %v307_v51, 0.0  ;;  %v339_v54 = vmul.f32 0.1, %v307_v51  ;;  %v296_v57 = vadd.f32 %v1089_v37, %v204_v52  ;;  %v519_v52 = vpop.f32.mrf.mxu1 }
  0xb1   :  { %v355_v55 = vsel %vm323_vm3, %v307_v51, %v339_v54  ;;  %v328_v60 = vmul.f32 0.1, %v296_v57  ;;  %vm312_vm4 = vcmp.gt.f32.partialorder %v296_v57, 0.0 }
  0xb2   :  { %v364_v56 = vpack.c.bf16 %v355_v55, %v354_v53 }
  0xb3   :  { %v344_v1 = vsel %vm312_vm4, %v296_v57, %v328_v60  ;;  %v1122_v57 = vld [vmem:[%s1194_s6] ss:$0 sm:$0xff] }
  0xb4   :  { %v234_v58 = vpop.f32.mrf.mxu3  ;;  %645 = vmatmul.bf16.vlgmr.msra.gmra.mxu3 %v364_v56 }
  0xb5   :  { %v308_v62 = vadd.f32 %v1089_v37, %v234_v58 }
  0xb6   :  { %v206_v59 = vpop.f32.mrf.mxu0 }
  0xb7   :  { %v297_v61 = vadd.f32 %v1089_v37, %v206_v59  ;;  %v340_v3 = vmul.f32 0.1, %v308_v62  ;;  %vm324_vm6 = vcmp.gt.f32.partialorder %v308_v62, 0.0  ;;  %v521_v54 = vpop.f32.mrf.mxu1 }
  0xb9   :  { %v329_v63 = vmul.f32 0.1, %v297_v61  ;;  %vm313_vm5 = vcmp.gt.f32.partialorder %v297_v61, 0.0  ;;  %v356_v9 = vsel %vm324_vm6, %v308_v62, %v340_v3 }
  0xbb   :  { %v345_v2 = vsel %vm313_vm5, %v297_v61, %v329_v63 }
  0xbc   :  { %v359_v4 = vpack.c.bf16 %v345_v2, %v344_v1  ;;  %v236_v5 = vpop.f32.mrf.mxu3 }
  0xbd   :  { %v309_v6 = vadd.f32 %v1089_v37, %v236_v5 }
  0xbe   :  { %v209_v7 = vpop.f32.mrf.mxu0  ;;  %620 = vmatmul.bf16.gmra.mxu2 %v359_v4 }
  0xbf   :  { %v341_v8 = vmul.f32 0.1, %v309_v6  ;;  %vm325_vm7 = vcmp.gt.f32.partialorder %v309_v6, 0.0  ;;  %v298_v12 = vadd.f32 %v1089_v37, %v209_v7  ;;  %v524_v56 = vpop.f32.mrf.mxu1 }
  0xc1   :  { %v357_v10 = vsel %vm325_vm7, %v309_v6, %v341_v8  ;;  %v330_v14 = vmul.f32 0.1, %v298_v12  ;;  %vm314_vm8 = vcmp.gt.f32.partialorder %v298_v12, 0.0 }
  0xc2   :  { %v365_v11 = vpack.c.bf16 %v357_v10, %v356_v9 }
  0xc3   :  { %v346_v18 = vsel %vm314_vm8, %v298_v12, %v330_v14 }
  0xc4   :  { %650 = vmatmul.bf16.gmra.mxu3 %v365_v11  ;;  %v549_v50 = vpop.f32.mrf.mxu3 }
  0xc6   :  { %v211_v13 = vpop.f32.mrf.mxu0 }
  0xc7   :  { %v299_v15 = vadd.f32 %v1089_v37, %v211_v13  ;;  %v526_v0 = vpop.f32.mrf.mxu1 }
  0xc9   :  { %v331_v16 = vmul.f32 0.1, %v299_v15  ;;  %vm315_vm9 = vcmp.gt.f32.partialorder %v299_v15, 0.0 }
  0xcb   :  { %v347_v19 = vsel %vm315_vm9, %v299_v15, %v331_v16 }
  0xcc   :  { %v360_v20 = vpack.c.bf16 %v347_v19, %v346_v18  ;;  %v551_v51 = vpop.f32.mrf.mxu3 }
  0xce   :  { %v214_v21 = vpop.f32.mrf.mxu0  ;;  %625 = vmatmul.bf16.gmra.mxu2 %v360_v20 }
  0xcf   :  { %v300_v22 = vadd.f32 %v1089_v37, %v214_v21  ;;  %v529_v11 = vpop.f32.mrf.mxu1 }
  0xd1   :  { %v332_v24 = vmul.f32 0.1, %v300_v22  ;;  %vm316_vm10 = vcmp.gt.f32.partialorder %v300_v22, 0.0 }
  0xd3   :  { %v348_v28 = vsel %vm316_vm10, %v300_v22, %v332_v24 }
  0xd4   :  { %v554_v53 = vpop.f32.mrf.mxu3 }
  0xd6   :  { %v216_v23 = vpop.f32.mrf.mxu0 }
  0xd7   :  { %v301_v25 = vadd.f32 %v1089_v37, %v216_v23  ;;  %v531_v22 = vpop.f32.mrf.mxu1 }
  0xd9   :  { %v333_v26 = vmul.f32 0.1, %v301_v25  ;;  %vm317_vm11 = vcmp.gt.f32.partialorder %v301_v25, 0.0 }
  0xdb   :  { %v349_v29 = vsel %vm317_vm11, %v301_v25, %v333_v26 }
  0xdc   :  { %v361_v30 = vpack.c.bf16 %v349_v29, %v348_v28  ;;  %v556_v55 = vpop.f32.mrf.mxu3 }
  0xde   :  { %v219_v31 = vpop.f32.mrf.mxu0  ;;  %630 = vmatmul.bf16.gmra.mxu2 %v361_v30 }
  0xdf   :  { %v302_v32 = vadd.f32 %v1089_v37, %v219_v31 }
  0xe1   :  { %v334_v34 = vmul.f32 0.1, %v302_v32  ;;  %vm318_vm12 = vcmp.gt.f32.partialorder %v302_v32, 0.0 }
  0xe3   :  { %v350_v38 = vsel %vm318_vm12, %v302_v32, %v334_v34  ;;  %v534_v32 = vpop.f32.mrf.mxu1 }
  0xe6   :  { %v221_v33 = vpop.f32.mrf.mxu0 }
  0xe7   :  { %v303_v35 = vadd.f32 %v1089_v37, %v221_v33 }
  0xe9   :  { %v335_v36 = vmul.f32 0.1, %v303_v35  ;;  %vm319_vm13 = vcmp.gt.f32.partialorder %v303_v35, 0.0 }
  0xeb   :  { %v351_v39 = vsel %vm319_vm13, %v303_v35, %v335_v36 }
  0xec   :  { %v362_v40 = vpack.c.bf16 %v351_v39, %v350_v38  ;;  %v536_v38 = vpop.f32.mrf.mxu1 }
  0xee   :  { %v224_v41 = vpop.f32.mrf.mxu0  ;;  %635 = vmatmul.bf16.gmra.mxu2 %v362_v40 }
  0xef   :  { %v304_v42 = vadd.f32 %v1089_v37, %v224_v41 }
  0xf1   :  { %v336_v44 = vmul.f32 0.1, %v304_v42  ;;  %vm320_vm14 = vcmp.gt.f32.partialorder %v304_v42, 0.0 }
  0xf3   :  { %v352_v47 = vsel %vm320_vm14, %v304_v42, %v336_v44 }
  0xf6   :  { %v226_v43 = vpop.f32.mrf.mxu0 }
  0xf7   :  { %v305_v45 = vadd.f32 %v1089_v37, %v226_v43 }
  0xf9   :  { %v337_v46 = vmul.f32 0.1, %v305_v45  ;;  %vm321_vm15 = vcmp.gt.f32.partialorder %v305_v45, 0.0 }
  0xfb   :  { %v353_v48 = vsel %vm321_vm15, %v305_v45, %v337_v46  ;;  %v539_v45 = vpop.f32.mrf.mxu1 }
  0xfc   :  { %v363_v49 = vpack.c.bf16 %v353_v48, %v352_v47 }
  0xfe   :  { %640 = vmatmul.bf16.gmra.mxu2 %v363_v49 }
 0x131   :  { %v616_v37 = vpop.f32.mrf.mxu2 }
 0x132   :  { %v617_v58 = vadd.f32 %v616_v37, %v519_v52 }
 0x134   :  { %v660_v59 = vadd.f32 %v1122_v57, %v617_v58 }
 0x136   :  { %v676_v60 = vmax.f32 %v660_v59, 0.0 }
 0x137   :  { %v646_v61 = vpop.f32.mrf.mxu3 }
 0x138   :  { %692 = vst [vmem:[%s1195_s7] sm:$0xff] %v676_v60  ;;  %v647_v62 = vadd.f32 %v646_v61, %v549_v50 }
 0x139   :  { %v618_v63 = vpop.f32.mrf.mxu2 }
 0x13a   :  { %v619_v1 = vadd.f32 %v618_v63, %v521_v54  ;;  %v672_v2 = vadd.f32 %v1122_v57, %v647_v62 }
 0x13c   :  { %v661_v3 = vadd.f32 %v1122_v57, %v619_v1  ;;  %v688_v4 = vmax.f32 %v672_v2, 0.0 }
 0x13e   :  { %v677_v5 = vmax.f32 %v661_v3, 0.0  ;;  %704 = vst [vmem:[%s1195_s7 + $0x60] sm:$0xff] %v688_v4 }
 0x13f   :  { %v648_v6 = vpop.f32.mrf.mxu3 }
 0x140   :  { %693 = vst [vmem:[%s1195_s7 + $0x8] sm:$0xff] %v677_v5  ;;  %v649_v7 = vadd.f32 %v648_v6, %v551_v51  ;;  %v541_v51 = vpop.f32.mrf.mxu1 }
 0x141   :  { %v621_v8 = vpop.f32.mrf.mxu2 }
 0x142   :  { %v622_v9 = vadd.f32 %v621_v8, %v524_v56  ;;  %v673_v10 = vadd.f32 %v1122_v57, %v649_v7 }
 0x144   :  { %v662_v12 = vadd.f32 %v1122_v57, %v622_v9  ;;  %v689_v13 = vmax.f32 %v673_v10, 0.0 }
 0x146   :  { %v678_v14 = vmax.f32 %v662_v12, 0.0  ;;  %705 = vst [vmem:[%s1195_s7 + $0x68] sm:$0xff] %v689_v13 }
 0x147   :  { %v651_v15 = vpop.f32.mrf.mxu3 }
 0x148   :  { %694 = vst [vmem:[%s1195_s7 + $0x10] sm:$0xff] %v678_v14  ;;  %v652_v16 = vadd.f32 %v651_v15, %v554_v53  ;;  %v544_v37 = vpop.f32.mrf.mxu1 }
 0x149   :  { %v623_v17 = vpop.f32.mrf.mxu2 }
 0x14a   :  { %v624_v18 = vadd.f32 %v623_v17, %v526_v0  ;;  %v674_v19 = vadd.f32 %v1122_v57, %v652_v16 }
 0x14c   :  { %v663_v20 = vadd.f32 %v1122_v57, %v624_v18  ;;  %v690_v21 = vmax.f32 %v674_v19, 0.0 }
 0x14e   :  { %v679_v23 = vmax.f32 %v663_v20, 0.0  ;;  %706 = vst [vmem:[%s1195_s7 + $0x70] sm:$0xff] %v690_v21 }
 0x14f   :  { %v653_v24 = vpop.f32.mrf.mxu3 }
 0x150   :  { %695 = vst [vmem:[%s1195_s7 + $0x18] sm:$0xff] %v679_v23  ;;  %v654_v25 = vadd.f32 %v653_v24, %v556_v55  ;;  %v546_v62 = vpop.f32.mrf.mxu1 }
 0x151   :  { %v626_v26 = vpop.f32.mrf.mxu2 }
 0x152   :  { %v627_v27 = vadd.f32 %v626_v26, %v529_v11  ;;  %v675_v28 = vadd.f32 %v1122_v57, %v654_v25 }
 0x154   :  { %v664_v29 = vadd.f32 %v1122_v57, %v627_v27  ;;  %v691_v30 = vmax.f32 %v675_v28, 0.0 }
 0x156   :  { %v680_v31 = vmax.f32 %v664_v29, 0.0  ;;  %707 = vst [vmem:[%s1195_s7 + $0x78] sm:$0xff] %v691_v30 }
 0x158   :  { %696 = vst [vmem:[%s1195_s7 + $0x20] sm:$0xff] %v680_v31 }
 0x159   :  { %v628_v33 = vpop.f32.mrf.mxu2 }
 0x15a   :  { %v629_v34 = vadd.f32 %v628_v33, %v531_v22 }
 0x15c   :  { %v665_v35 = vadd.f32 %v1122_v57, %v629_v34 }
 0x15e   :  { %v681_v36 = vmax.f32 %v665_v35, 0.0 }
 0x160   :  { %697 = vst [vmem:[%s1195_s7 + $0x28] sm:$0xff] %v681_v36 }
 0x161   :  { %v631_v39 = vpop.f32.mrf.mxu2 }
 0x162   :  { %v632_v40 = vadd.f32 %v631_v39, %v534_v32 }
 0x164   :  { %v666_v41 = vadd.f32 %v1122_v57, %v632_v40 }
 0x166   :  { %v682_v42 = vmax.f32 %v666_v41, 0.0 }
 0x168   :  { %698 = vst [vmem:[%s1195_s7 + $0x30] sm:$0xff] %v682_v42 }
 0x169   :  { %v633_v43 = vpop.f32.mrf.mxu2 }
 0x16a   :  { %v634_v44 = vadd.f32 %v633_v43, %v536_v38 }
 0x16c   :  { %v667_v46 = vadd.f32 %v1122_v57, %v634_v44 }
 0x16e   :  { %v683_v47 = vmax.f32 %v667_v46, 0.0 }
 0x170   :  { %699 = vst [vmem:[%s1195_s7 + $0x38] sm:$0xff] %v683_v47 }
 0x171   :  { %v636_v48 = vpop.f32.mrf.mxu2 }
 0x172   :  { %v637_v49 = vadd.f32 %v636_v48, %v539_v45 }
 0x174   :  { %v668_v50 = vadd.f32 %v1122_v57, %v637_v49 }
 0x176   :  { %v684_v52 = vmax.f32 %v668_v50, 0.0 }
 0x178   :  { %700 = vst [vmem:[%s1195_s7 + $0x40] sm:$0xff] %v684_v52 }
 0x179   :  { %v638_v53 = vpop.f32.mrf.mxu2 }
 0x17a   :  { %v639_v54 = vadd.f32 %v638_v53, %v541_v51 }
 0x17c   :  { %v669_v55 = vadd.f32 %v1122_v57, %v639_v54 }
 0x17e   :  { %v685_v56 = vmax.f32 %v669_v55, 0.0 }
 0x180   :  { %701 = vst [vmem:[%s1195_s7 + $0x48] sm:$0xff] %v685_v56 }
 0x181   :  { %v641_v58 = vpop.f32.mrf.mxu2 }
 0x182   :  { %v642_v59 = vadd.f32 %v641_v58, %v544_v37 }
 0x184   :  { %v670_v60 = vadd.f32 %v1122_v57, %v642_v59 }
 0x186   :  { %v686_v61 = vmax.f32 %v670_v60, 0.0 }
 0x188   :  { %702 = vst [vmem:[%s1195_s7 + $0x50] sm:$0xff] %v686_v61 }
 0x189   :  { %v643_v63 = vpop.f32.mrf.mxu2 }
 0x18a   :  { %v644_v0 = vadd.f32 %v643_v63, %v546_v62 }
 0x18c   :  { %v671_v1 = vadd.f32 %v1122_v57, %v644_v0 }
 0x18e   :  { %v687_v2 = vmax.f32 %v671_v1, 0.0 }
 0x190   :  { %703 = vst [vmem:[%s1195_s7 + $0x58] sm:$0xff] %v687_v2 }

// kernel: gnn_forward.4
= control target key start
LH: loop header
LB: loop body
LE: loop exit
PB: predicated region body
PF: predicated region fallthrough
CT: control target
= control target key end

     0   :  { %s1862_s1 = inlined_call_operand.vmem [shape: bf16[128,128], index: 1, kind: input, shape index: {}]   ;;  %s1863_s3 = inlined_call_operand.vmem [shape: f32[1,128], index: 3, kind: input, shape index: {}]   ;;  %s1864_s2 = inlined_call_operand.vmem [shape: bf16[128,128], index: 2, kind: input, shape index: {}]   ;;  %s1865_s0 = inlined_call_operand.vmem [shape: bf16[128,128], index: 0, kind: input, shape index: {}]   ;;  %s1866_s4 = inlined_call_operand.vmem [shape: f32[1,128], index: 4, kind: input, shape index: {}]   ;;  %s1867_s5 = inlined_call_operand.vmem [shape: bf16[128,128], index: 5, kind: input, shape index: {}]   ;;  %s1868_s8 = inlined_call_operand.vmem [shape: bf16[128,128], index: 8, kind: input, shape index: {}]   ;;  %s1869_s7 = inlined_call_operand.vmem [shape: bf16[128,128], index: 7, kind: input, shape index: {}]   ;;  %s1870_s6 = inlined_call_operand.vmem [shape: bf16[128,128], index: 6, kind: input, shape index: {}]   ;;  %s1871_s9 = inlined_call_operand.vmem [shape: f32[1,128], index: 9, kind: input, shape index: {}]   ;;  %s1872_s10 = inlined_call_operand.vmem [shape: bf16[128,128], index: 10, kind: output, shape index: {0}]   ;;  %s1873_s11 = inlined_call_operand.vmem [shape: f32[128,128], index: 11, kind: output, shape index: {1}]  }
   0x1   :  { %v1380_v0 = vld [vmem:[%s1862_s1 + $0x38] sm:$0xff]  ;;  %v1379_v1 = vld [vmem:[%s1862_s1 + $0x30] sm:$0xff]  ;;  %v1378_v2 = vld [vmem:[%s1862_s1 + $0x28] sm:$0xff] }
   0x2   :  { %217 = vmatpush.bf16.msra.mxu0 %v1380_v0  ;;  %1468 = vmatpush.bf16.msra.mxu1 %v1380_v0  ;;  %v1377_v3 = vld [vmem:[%s1862_s1 + $0x20] sm:$0xff]  ;;  %v1376_v4 = vld [vmem:[%s1862_s1 + $0x18] sm:$0xff]  ;;  %v1375_v5 = vld [vmem:[%s1862_s1 + $0x10] sm:$0xff] }
   0x3   :  { %1469 = vmatpush.bf16.msra.mxu2 %v1380_v0  ;;  %1470 = vmatpush.bf16.msra.mxu3 %v1380_v0  ;;  %v1374_v6 = vld [vmem:[%s1862_s1 + $0x8] sm:$0xff]  ;;  %v1373_v7 = vld [vmem:[%s1862_s1] sm:$0xff]  ;;  %v1388_v8 = vld [vmem:[%s1864_s2 + $0x38] sm:$0xff] }
   0x4   :  { %v1365_v9 = vld [vmem:[%s1865_s0] sm:$0xff]  ;;  %v1367_v10 = vld [vmem:[%s1865_s0 + $0x10] sm:$0xff]  ;;  %v1386_v12 = vld [vmem:[%s1864_s2 + $0x28] sm:$0xff] }
   0x5   :  { %v1387_v11 = vld [vmem:[%s1864_s2 + $0x30] sm:$0xff]  ;;  %v1385_v13 = vld [vmem:[%s1864_s2 + $0x20] sm:$0xff]  ;;  %v1384_v14 = vld [vmem:[%s1864_s2 + $0x18] sm:$0xff] }
   0x6   :  { %218 = vmatpush.bf16.msra.mxu0 %v1379_v1  ;;  %1471 = vmatpush.bf16.msra.mxu1 %v1379_v1  ;;  %v1366_v15 = vld [vmem:[%s1865_s0 + $0x8] sm:$0xff]  ;;  %v1368_v16 = vld [vmem:[%s1865_s0 + $0x18] sm:$0xff]  ;;  %v1383_v17 = vld [vmem:[%s1864_s2 + $0x10] sm:$0xff] }
   0x7   :  { %1472 = vmatpush.bf16.msra.mxu2 %v1379_v1  ;;  %1473 = vmatpush.bf16.msra.mxu3 %v1379_v1  ;;  %v1382_v18 = vld [vmem:[%s1864_s2 + $0x8] sm:$0xff]  ;;  %v1381_v19 = vld [vmem:[%s1864_s2] sm:$0xff]  ;;  %v1371_v22 = vld [vmem:[%s1865_s0 + $0x30] sm:$0xff] }
   0x8   :  { %v1369_v20 = vld [vmem:[%s1865_s0 + $0x20] sm:$0xff]  ;;  %v1370_v21 = vld [vmem:[%s1865_s0 + $0x28] sm:$0xff]  ;;  %v1396_v23 = vld [vmem:[%s1867_s5 + $0x38] sm:$0xff] }
   0x9   :  { %v1395_v24 = vld [vmem:[%s1867_s5 + $0x30] sm:$0xff]  ;;  %v1633_v25 = vld [vmem:[%s1865_s0 + $0x38] sm:$0xff]  ;;  %v1394_v26 = vld [vmem:[%s1867_s5 + $0x28] sm:$0xff] }
   0xa   :  { %219 = vmatpush.bf16.msra.mxu0 %v1378_v2  ;;  %1474 = vmatpush.bf16.msra.mxu1 %v1378_v2  ;;  %v1393_v27 = vld [vmem:[%s1867_s5 + $0x20] sm:$0xff]  ;;  %v1392_v28 = vld [vmem:[%s1867_s5 + $0x18] sm:$0xff]  ;;  %v1391_v30 = vld [vmem:[%s1867_s5 + $0x10] sm:$0xff] }
   0xb   :  { %1475 = vmatpush.bf16.msra.mxu2 %v1378_v2  ;;  %1476 = vmatpush.bf16.msra.mxu3 %v1378_v2  ;;  %v1420_v29 = vld [vmem:[%s1868_s8 + $0x38] sm:$0xff]  ;;  %v1419_v31 = vld [vmem:[%s1868_s8 + $0x30] sm:$0xff]  ;;  %v1390_v32 = vld [vmem:[%s1867_s5 + $0x8] sm:$0xff] }
   0xc   :  { %v1418_v33 = vld [vmem:[%s1868_s8 + $0x28] sm:$0xff]  ;;  %v1389_v34 = vld [vmem:[%s1867_s5] sm:$0xff]  ;;  %v1404_v36 = vld [vmem:[%s1869_s7 + $0x38] sm:$0xff] }
   0xd   :  { %v1417_v35 = vld [vmem:[%s1868_s8 + $0x20] sm:$0xff]  ;;  %v1416_v37 = vld [vmem:[%s1868_s8 + $0x18] sm:$0xff]  ;;  %v1403_v38 = vld [vmem:[%s1869_s7 + $0x30] sm:$0xff] }
   0xe   :  { %220 = vmatpush.bf16.msra.mxu0 %v1377_v3  ;;  %1477 = vmatpush.bf16.msra.mxu1 %v1377_v3  ;;  %v1415_v39 = vld [vmem:[%s1868_s8 + $0x10] sm:$0xff]  ;;  %v1402_v40 = vld [vmem:[%s1869_s7 + $0x28] sm:$0xff]  ;;  %v1401_v42 = vld [vmem:[%s1869_s7 + $0x20] sm:$0xff] }
   0xf   :  { %1478 = vmatpush.bf16.msra.mxu2 %v1377_v3  ;;  %1479 = vmatpush.bf16.msra.mxu3 %v1377_v3  ;;  %v1414_v41 = vld [vmem:[%s1868_s8 + $0x8] sm:$0xff]  ;;  %v1413_v43 = vld [vmem:[%s1868_s8] sm:$0xff]  ;;  %v1400_v44 = vld [vmem:[%s1869_s7 + $0x18] sm:$0xff] }
  0x10   :  { %v1405_v47 = vld [vmem:[%s1870_s6] sm:$0xff]  ;;  %v1399_v50 = vld [vmem:[%s1869_s7 + $0x10] sm:$0xff]  ;;  %v1398_v52 = vld [vmem:[%s1869_s7 + $0x8] sm:$0xff] }
  0x11   :  { %v1699_v48 = vld [vmem:[%s1863_s3] ss:$0 sm:$0xff]  ;;  %v1406_v63 = vld [vmem:[%s1870_s6 + $0x8] sm:$0xff] }
  0x12   :  { %221 = vmatpush.bf16.msra.mxu0 %v1376_v4  ;;  %1480 = vmatpush.bf16.msra.mxu1 %v1376_v4  ;;  %v1397_v58 = vld [vmem:[%s1869_s7] sm:$0xff] }
  0x13   :  { %1481 = vmatpush.bf16.msra.mxu2 %v1376_v4  ;;  %1482 = vmatpush.bf16.msra.mxu3 %v1376_v4 }
  0x16   :  { %222 = vmatpush.bf16.msra.mxu0 %v1375_v5  ;;  %1483 = vmatpush.bf16.msra.mxu1 %v1375_v5 }
  0x17   :  { %1484 = vmatpush.bf16.msra.mxu2 %v1375_v5  ;;  %1485 = vmatpush.bf16.msra.mxu3 %v1375_v5 }
  0x1a   :  { %223 = vmatpush.bf16.msra.mxu0 %v1374_v6  ;;  %1486 = vmatpush.bf16.msra.mxu1 %v1374_v6 }
  0x1b   :  { %1487 = vmatpush.bf16.msra.mxu2 %v1374_v6  ;;  %1488 = vmatpush.bf16.msra.mxu3 %v1374_v6 }
  0x1e   :  { %224 = vmatpush.bf16.msra.mxu0 %v1373_v7  ;;  %1489 = vmatpush.bf16.msra.mxu1 %v1373_v7 }
  0x1f   :  { %1490 = vmatpush.bf16.msra.mxu2 %v1373_v7  ;;  %1491 = vmatpush.bf16.msra.mxu3 %v1373_v7 }
  0x21   :  { %225 = vmatmul.bf16.vlgmr.msra.gmra.mxu0 %v1365_v9  ;;  %235 = vmatmul.bf16.vlgmr.msra.gmra.mxu1 %v1367_v10 }
  0x22   :  { %378 = vmatpush.bf16.msrb.mxu1 %v1388_v8  ;;  %245 = vmatmul.bf16.vlgmr.msra.gmra.mxu2 %v1369_v20 }
  0x23   :  { %255 = vmatmul.bf16.vlgmr.msra.gmra.mxu3 %v1371_v22  ;;  %618 = vmatpush.bf16.msrb.mxu2 %v1396_v23 }
  0x24   :  { %935 = vmatpush.bf16.msrb.mxu3 %v1420_v29  ;;  %1032 = vmatpush.bf16.msrb.mxu0 %v1404_v36  ;;  %v1408_v29 = vld [vmem:[%s1870_s6 + $0x18] sm:$0xff] }
  0x26   :  { %379 = vmatpush.bf16.msrb.mxu1 %v1387_v11  ;;  %v1407_v11 = vld [vmem:[%s1870_s6 + $0x10] sm:$0xff] }
  0x27   :  { %619 = vmatpush.bf16.msrb.mxu2 %v1395_v24 }
  0x28   :  { %936 = vmatpush.bf16.msrb.mxu3 %v1419_v31  ;;  %1033 = vmatpush.bf16.msrb.mxu0 %v1403_v38 }
  0x2a   :  { %380 = vmatpush.bf16.msrb.mxu1 %v1386_v12 }
  0x2b   :  { %620 = vmatpush.bf16.msrb.mxu2 %v1394_v26 }
  0x2c   :  { %937 = vmatpush.bf16.msrb.mxu3 %v1418_v33  ;;  %1034 = vmatpush.bf16.msrb.mxu0 %v1402_v40 }
  0x2e   :  { %381 = vmatpush.bf16.msrb.mxu1 %v1385_v13 }
  0x2f   :  { %621 = vmatpush.bf16.msrb.mxu2 %v1393_v27 }
  0x30   :  { %938 = vmatpush.bf16.msrb.mxu3 %v1417_v35  ;;  %1035 = vmatpush.bf16.msrb.mxu0 %v1401_v42 }
  0x31   :  { %230 = vmatmul.bf16.gmra.mxu0 %v1366_v15  ;;  %240 = vmatmul.bf16.gmra.mxu1 %v1368_v16 }
  0x32   :  { %382 = vmatpush.bf16.msrb.mxu1 %v1384_v14  ;;  %250 = vmatmul.bf16.gmra.mxu2 %v1370_v21 }
  0x33   :  { %260 = vmatmul.bf16.gmra.mxu3 %v1633_v25  ;;  %622 = vmatpush.bf16.msrb.mxu2 %v1392_v28 }
  0x34   :  { %939 = vmatpush.bf16.msrb.mxu3 %v1416_v37  ;;  %1036 = vmatpush.bf16.msrb.mxu0 %v1400_v44 }
  0x36   :  { %383 = vmatpush.bf16.msrb.mxu1 %v1383_v17 }
  0x37   :  { %623 = vmatpush.bf16.msrb.mxu2 %v1391_v30 }
  0x38   :  { %940 = vmatpush.bf16.msrb.mxu3 %v1415_v39  ;;  %1037 = vmatpush.bf16.msrb.mxu0 %v1399_v50  ;;  %v1409_v50 = vld [vmem:[%s1870_s6 + $0x20] sm:$0xff] }
  0x3a   :  { %384 = vmatpush.bf16.msrb.mxu1 %v1382_v18 }
  0x3b   :  { %624 = vmatpush.bf16.msrb.mxu2 %v1390_v32 }
  0x3c   :  { %941 = vmatpush.bf16.msrb.mxu3 %v1414_v41  ;;  %1038 = vmatpush.bf16.msrb.mxu0 %v1398_v52 }
  0x3e   :  { %385 = vmatpush.bf16.msrb.mxu1 %v1381_v19 }
  0x3f   :  { %625 = vmatpush.bf16.msrb.mxu2 %v1389_v34 }
  0x40   :  { %942 = vmatpush.bf16.msrb.mxu3 %v1413_v43  ;;  %1039 = vmatpush.bf16.msrb.mxu0 %v1397_v58 }
  0x41   :  { %386 = vmatmul.bf16.vlgmr.msrb.gmra.mxu1 %v1365_v9 }
  0x43   :  { %943 = vmatmul.bf16.vlgmr.msrb.gmra.mxu3 %v1405_v47 }
  0x51   :  { %391 = vmatmul.bf16.gmra.mxu1 %v1366_v15 }
  0x53   :  { %948 = vmatmul.bf16.gmra.mxu3 %v1406_v63 }
  0x61   :  { %396 = vmatmul.bf16.gmra.mxu1 %v1367_v10  ;;  %v1721_v10 = vld [vmem:[%s1866_s4] ss:$0 sm:$0xff] }
  0x63   :  { %953 = vmatmul.bf16.gmra.mxu3 %v1407_v11 }
  0x71   :  { %401 = vmatmul.bf16.gmra.mxu1 %v1368_v16 }
  0x73   :  { %958 = vmatmul.bf16.gmra.mxu3 %v1408_v29 }
  0x81   :  { %406 = vmatmul.bf16.gmra.mxu1 %v1369_v20 }
  0x83   :  { %963 = vmatmul.bf16.gmra.mxu3 %v1409_v50 }
  0x91   :  { %411 = vmatmul.bf16.gmra.mxu1 %v1370_v21 }
  0x9e   :  { %v226_v45 = vpop.f32.mrf.mxu0  ;;  %v236_v46 = vpop.f32.mrf.mxu1 }
  0x9f   :  { %v482_v49 = vadd.f32 %v1699_v48, %v226_v45  ;;  %v486_v13 = vadd.f32 %v1699_v48, %v236_v46 }
  0xa1   :  { %416 = vmatmul.bf16.gmra.mxu1 %v1371_v22  ;;  %v514_v51 = vmul.f32 0.1, %v482_v49  ;;  %vm498_vm0 = vcmp.gt.f32.partialorder %v482_v49, 0.0  ;;  %v518_v17 = vmul.f32 0.1, %v486_v13  ;;  %vm502_vm6 = vcmp.gt.f32.partialorder %v486_v13, 0.0 }
  0xa3   :  { %v530_v57 = vsel %vm498_vm0, %v482_v49, %v514_v51  ;;  %v534_v22 = vsel %vm502_vm6, %v486_v13, %v518_v17 }
  0xa5   :  { %v246_v28 = vpop.f32.mrf.mxu2 }
  0xa6   :  { %v228_v53 = vpop.f32.mrf.mxu0  ;;  %v238_v54 = vpop.f32.mrf.mxu1  ;;  %v490_v47 = vadd.f32 %v1699_v48, %v246_v28 }
  0xa7   :  { %v483_v55 = vadd.f32 %v1699_v48, %v228_v53  ;;  %v487_v12 = vadd.f32 %v1699_v48, %v238_v54 }
  0xa8   :  { %v522_v53 = vmul.f32 0.1, %v490_v47  ;;  %vm506_vm12 = vcmp.gt.f32.partialorder %v490_v47, 0.0 }
  0xa9   :  { %vm499_vm1 = vcmp.gt.f32.partialorder %v483_v55, 0.0  ;;  %v515_v56 = vmul.f32 0.1, %v483_v55  ;;  %v519_v15 = vmul.f32 0.1, %v487_v12  ;;  %vm503_vm4 = vcmp.gt.f32.partialorder %v487_v12, 0.0 }
  0xaa   :  { %v538_v58 = vsel %vm506_vm12, %v490_v47, %v522_v53 }
  0xab   :  { %v531_v59 = vsel %vm499_vm1, %v483_v55, %v515_v56  ;;  %v535_v21 = vsel %vm503_vm4, %v487_v12, %v519_v15 }
  0xac   :  { %v546_v60 = vpack.c.bf16 %v531_v59, %v530_v57 }
  0xad   :  { %v248_v38 = vpop.f32.mrf.mxu2 }
  0xae   :  { %v231_v61 = vpop.f32.mrf.mxu0  ;;  %v241_v62 = vpop.f32.mrf.mxu1  ;;  %626 = vmatmul.bf16.vlgmr.msrb.gmra.mxu2 %v546_v60  ;;  %v491_v49 = vadd.f32 %v1699_v48, %v248_v38 }
  0xaf   :  { %v484_v0 = vadd.f32 %v1699_v48, %v231_v61  ;;  %v488_v31 = vadd.f32 %v1699_v48, %v241_v62 }
  0xb0   :  { %v523_v54 = vmul.f32 0.1, %v491_v49  ;;  %vm507_vm13 = vcmp.gt.f32.partialorder %v491_v49, 0.0 }
  0xb1   :  { %421 = vmatmul.bf16.gmra.mxu1 %v1633_v25  ;;  %v516_v1 = vmul.f32 0.1, %v484_v0  ;;  %vm500_vm2 = vcmp.gt.f32.partialorder %v484_v0, 0.0  ;;  %v548_v25 = vpack.c.bf16 %v535_v21, %v534_v22  ;;  %v520_v35 = vmul.f32 0.1, %v488_v31 }
  0xb2   :  { %vm504_vm9 = vcmp.gt.f32.partialorder %v488_v31, 0.0  ;;  %v539_v59 = vsel %vm507_vm13, %v491_v49, %v523_v54 }
  0xb3   :  { %v532_v6 = vsel %vm500_vm2, %v484_v0, %v516_v1  ;;  %v536_v41 = vsel %vm504_vm9, %v488_v31, %v520_v35  ;;  %v550_v61 = vpack.c.bf16 %v539_v59, %v538_v58 }
  0xb5   :  { %v251_v51 = vpop.f32.mrf.mxu2 }
  0xb6   :  { %v233_v2 = vpop.f32.mrf.mxu0  ;;  %v243_v3 = vpop.f32.mrf.mxu1 }
  0xb7   :  { %v485_v4 = vadd.f32 %v1699_v48, %v233_v2  ;;  %v489_v30 = vadd.f32 %v1699_v48, %v243_v3  ;;  %v256_v3 = vpop.f32.mrf.mxu3 }
  0xb9   :  { %v517_v5 = vmul.f32 0.1, %v485_v4  ;;  %vm501_vm3 = vcmp.gt.f32.partialorder %v485_v4, 0.0  ;;  %v521_v33 = vmul.f32 0.1, %v489_v30  ;;  %vm505_vm8 = vcmp.gt.f32.partialorder %v489_v30, 0.0 }
  0xbb   :  { %v533_v7 = vsel %vm501_vm3, %v485_v4, %v517_v5  ;;  %v537_v40 = vsel %vm505_vm8, %v489_v30, %v521_v33  ;;  %v492_v4 = vadd.f32 %v1699_v48, %v251_v51 }
  0xbc   :  { %v547_v8 = vpack.c.bf16 %v533_v7, %v532_v6  ;;  %v549_v44 = vpack.c.bf16 %v537_v40, %v536_v41  ;;  %v1410_v6 = vld [vmem:[%s1870_s6 + $0x28] sm:$0xff] }
  0xbd   :  { %v253_v1 = vpop.f32.mrf.mxu2  ;;  %968 = vmatmul.bf16.gmra.mxu3 %v1410_v6  ;;  %vm508_vm0 = vcmp.gt.f32.partialorder %v492_v4, 0.0 }
  0xbe   :  { %v387_v9 = vpop.f32.mrf.mxu1  ;;  %631 = vmatmul.bf16.gmra.mxu2 %v547_v8  ;;  %v493_v5 = vadd.f32 %v1699_v48, %v253_v1  ;;  %v524_v8 = vmul.f32 0.1, %v492_v4 }
  0xbf   :  { %v719_v14 = vadd.f32 %v1721_v10, %v387_v9 }
  0xc0   :  { %v525_v9 = vmul.f32 0.1, %v493_v5  ;;  %vm509_vm1 = vcmp.gt.f32.partialorder %v493_v5, 0.0 }
  0xc1   :  { %v751_v18 = vmul.f32 0.1, %v719_v14  ;;  %vm735_vm5 = vcmp.gt.f32.partialorder %v719_v14, 0.0 }
  0xc2   :  { %v541_v15 = vsel %vm509_vm1, %v493_v5, %v525_v9 }
  0xc3   :  { %v767_v23 = vsel %vm735_vm5, %v719_v14, %v751_v18  ;;  %v540_v14 = vsel %vm508_vm0, %v492_v4, %v524_v8 }
  0xc4   :  { %v551_v18 = vpack.c.bf16 %v541_v15, %v540_v14 }
  0xc6   :  { %v389_v16 = vpop.f32.mrf.mxu1 }
  0xc7   :  { %v720_v19 = vadd.f32 %v1721_v10, %v389_v16  ;;  %v258_v16 = vpop.f32.mrf.mxu3 }
  0xc9   :  { %vm736_vm7 = vcmp.gt.f32.partialorder %v720_v19, 0.0  ;;  %v752_v20 = vmul.f32 0.1, %v720_v19 }
  0xcb   :  { %v768_v24 = vsel %vm736_vm7, %v720_v19, %v752_v20 }
  0xcc   :  { %v783_v26 = vpack.c.bf16 %v768_v24, %v767_v23  ;;  %v494_v23 = vadd.f32 %v1699_v48, %v256_v3  ;;  %v495_v24 = vadd.f32 %v1699_v48, %v258_v16 }
  0xce   :  { %v392_v27 = vpop.f32.mrf.mxu1  ;;  %636 = vmatmul.bf16.gmra.mxu2 %v548_v25  ;;  %1040 = vmatmul.bf16.vlgmr.msrb.gmra.mxu0 %v783_v26  ;;  %v1411_v25 = vld [vmem:[%s1870_s6 + $0x30] sm:$0xff]  ;;  %v526_v28 = vmul.f32 0.1, %v494_v23  ;;  %v527_v29 = vmul.f32 0.1, %v495_v24  ;;  %vm510_vm4 = vcmp.gt.f32.partialorder %v494_v23, 0.0 }
  0xcf   :  { %v721_v32 = vadd.f32 %v1721_v10, %v392_v27  ;;  %973 = vmatmul.bf16.gmra.mxu3 %v1411_v25  ;;  %v261_v26 = vpop.f32.mrf.mxu3  ;;  %vm511_vm5 = vcmp.gt.f32.partialorder %v495_v24, 0.0 }
  0xd0   :  { %v542_v33 = vsel %vm510_vm4, %v494_v23, %v526_v28 }
  0xd1   :  { %v753_v36 = vmul.f32 0.1, %v721_v32  ;;  %vm737_vm10 = vcmp.gt.f32.partialorder %v721_v32, 0.0 }
  0xd3   :  { %v769_v42 = vsel %vm737_vm10, %v721_v32, %v753_v36 }
  0xd6   :  { %v394_v34 = vpop.f32.mrf.mxu1 }
  0xd7   :  { %v722_v37 = vadd.f32 %v1721_v10, %v394_v34  ;;  %v543_v34 = vsel %vm511_vm5, %v495_v24, %v527_v29  ;;  %v263_v40 = vpop.f32.mrf.mxu3 }
  0xd8   :  { %v552_v36 = vpack.c.bf16 %v543_v34, %v542_v33 }
  0xd9   :  { %v754_v39 = vmul.f32 0.1, %v722_v37  ;;  %vm738_vm11 = vcmp.gt.f32.partialorder %v722_v37, 0.0 }
  0xdb   :  { %v770_v43 = vsel %vm738_vm11, %v722_v37, %v754_v39 }
  0xdc   :  { %v784_v45 = vpack.c.bf16 %v770_v43, %v769_v42  ;;  %v496_v42 = vadd.f32 %v1699_v48, %v261_v26  ;;  %v497_v43 = vadd.f32 %v1699_v48, %v263_v40 }
  0xde   :  { %v397_v46 = vpop.f32.mrf.mxu1  ;;  %641 = vmatmul.bf16.gmra.mxu2 %v549_v44  ;;  %1045 = vmatmul.bf16.gmra.mxu0 %v784_v45  ;;  %v1412_v44 = vld [vmem:[%s1870_s6 + $0x38] sm:$0xff]  ;;  %v529_v47 = vmul.f32 0.1, %v497_v43  ;;  %vm512_vm8 = vcmp.gt.f32.partialorder %v496_v42, 0.0  ;;  %vm513_vm9 = vcmp.gt.f32.partialorder %v497_v43, 0.0 }
  0xdf   :  { %v723_v52 = vadd.f32 %v1721_v10, %v397_v46  ;;  %978 = vmatmul.bf16.gmra.mxu3 %v1412_v44  ;;  %v528_v46 = vmul.f32 0.1, %v496_v42  ;;  %v944_v3 = vpop.f32.mrf.mxu3 }
  0xe0   :  { %v545_v53 = vsel %vm513_vm9, %v497_v43, %v529_v47 }
  0xe1   :  { %v755_v56 = vmul.f32 0.1, %v723_v52  ;;  %vm739_vm14 = vcmp.gt.f32.partialorder %v723_v52, 0.0 }
  0xe3   :  { %v771_v62 = vsel %vm739_vm14, %v723_v52, %v755_v56  ;;  %v544_v52 = vsel %vm512_vm8, %v496_v42, %v528_v46 }
  0xe4   :  { %v553_v48 = vpack.c.bf16 %v545_v53, %v544_v52 }
  0xe6   :  { %v399_v55 = vpop.f32.mrf.mxu1 }
  0xe7   :  { %v724_v57 = vadd.f32 %v1721_v10, %v399_v55 }
  0xe9   :  { %v756_v60 = vmul.f32 0.1, %v724_v57  ;;  %vm740_vm15 = vcmp.gt.f32.partialorder %v724_v57, 0.0 }
  0xeb   :  { %v772_v63 = vsel %vm740_vm15, %v724_v57, %v756_v60 }
  0xec   :  { %v785_v0 = vpack.c.bf16 %v772_v63, %v771_v62 }
  0xee   :  { %v402_v2 = vpop.f32.mrf.mxu1  ;;  %1050 = vmatmul.bf16.gmra.mxu0 %v785_v0  ;;  %646 = vmatmul.bf16.gmra.mxu2 %v550_v61 }
  0xef   :  { %v725_v7 = vadd.f32 %v1721_v10, %v402_v2 }
  0xf1   :  { %v757_v12 = vmul.f32 0.1, %v725_v7  ;;  %vm741_vm2 = vcmp.gt.f32.partialorder %v725_v7, 0.0 }
  0xf3   :  { %v773_v19 = vsel %vm741_vm2, %v725_v7, %v757_v12 }
  0xf6   :  { %v404_v11 = vpop.f32.mrf.mxu1 }
  0xf7   :  { %v726_v13 = vadd.f32 %v1721_v10, %v404_v11  ;;  %v946_v11 = vpop.f32.mrf.mxu3 }
  0xf9   :  { %v758_v17 = vmul.f32 0.1, %v726_v13  ;;  %vm742_vm3 = vcmp.gt.f32.partialorder %v726_v13, 0.0 }
  0xfb   :  { %v774_v20 = vsel %vm742_vm3, %v726_v13, %v758_v17 }
  0xfc   :  { %v786_v21 = vpack.c.bf16 %v774_v20, %v773_v19 }
  0xfe   :  { %v407_v22 = vpop.f32.mrf.mxu1  ;;  %1055 = vmatmul.bf16.gmra.mxu0 %v786_v21  ;;  %651 = vmatmul.bf16.gmra.mxu2 %v551_v18 }
  0xff   :  { %v727_v27 = vadd.f32 %v1721_v10, %v407_v22  ;;  %v949_v19 = vpop.f32.mrf.mxu3 }
 0x101   :  { %v759_v31 = vmul.f32 0.1, %v727_v27  ;;  %vm743_vm6 = vcmp.gt.f32.partialorder %v727_v27, 0.0 }
 0x103   :  { %v775_v37 = vsel %vm743_vm6, %v727_v27, %v759_v31 }
 0x106   :  { %v409_v30 = vpop.f32.mrf.mxu1 }
 0x107   :  { %v728_v32 = vadd.f32 %v1721_v10, %v409_v30  ;;  %v951_v23 = vpop.f32.mrf.mxu3 }
 0x109   :  { %v760_v35 = vmul.f32 0.1, %v728_v32  ;;  %vm744_vm7 = vcmp.gt.f32.partialorder %v728_v32, 0.0 }
 0x10b   :  { %v776_v38 = vsel %vm744_vm7, %v728_v32, %v760_v35 }
 0x10c   :  { %v787_v39 = vpack.c.bf16 %v776_v38, %v775_v37 }
 0x10e   :  { %v412_v41 = vpop.f32.mrf.mxu1  ;;  %1060 = vmatmul.bf16.gmra.mxu0 %v787_v39  ;;  %656 = vmatmul.bf16.gmra.mxu2 %v552_v36 }
 0x10f   :  { %v729_v45 = vadd.f32 %v1721_v10, %v412_v41  ;;  %v954_v30 = vpop.f32.mrf.mxu3 }
 0x111   :  { %v761_v50 = vmul.f32 0.1, %v729_v45  ;;  %vm745_vm10 = vcmp.gt.f32.partialorder %v729_v45, 0.0 }
 0x113   :  { %v777_v55 = vsel %vm745_vm10, %v729_v45, %v761_v50 }
 0x116   :  { %v414_v49 = vpop.f32.mrf.mxu1 }
 0x117   :  { %v730_v51 = vadd.f32 %v1721_v10, %v414_v49  ;;  %v956_v38 = vpop.f32.mrf.mxu3 }
 0x119   :  { %v762_v54 = vmul.f32 0.1, %v730_v51  ;;  %vm746_vm11 = vcmp.gt.f32.partialorder %v730_v51, 0.0 }
 0x11b   :  { %v778_v56 = vsel %vm746_vm11, %v730_v51, %v762_v54 }
 0x11c   :  { %v788_v57 = vpack.c.bf16 %v778_v56, %v777_v55 }
 0x11e   :  { %v417_v58 = vpop.f32.mrf.mxu1  ;;  %1065 = vmatmul.bf16.gmra.mxu0 %v788_v57  ;;  %661 = vmatmul.bf16.gmra.mxu2 %v553_v48 }
 0x11f   :  { %v731_v59 = vadd.f32 %v1721_v10, %v417_v58  ;;  %v959_v46 = vpop.f32.mrf.mxu3 }
 0x121   :  { %v763_v61 = vmul.f32 0.1, %v731_v59  ;;  %vm747_vm12 = vcmp.gt.f32.partialorder %v731_v59, 0.0 }
 0x123   :  { %v779_v0 = vsel %vm747_vm12, %v731_v59, %v763_v61 }
 0x126   :  { %v419_v60 = vpop.f32.mrf.mxu1 }
 0x127   :  { %v732_v62 = vadd.f32 %v1721_v10, %v419_v60  ;;  %v961_v48 = vpop.f32.mrf.mxu3 }
 0x129   :  { %v764_v63 = vmul.f32 0.1, %v732_v62  ;;  %vm748_vm13 = vcmp.gt.f32.partialorder %v732_v62, 0.0 }
 0x12b   :  { %v780_v1 = vsel %vm748_vm13, %v732_v62, %v764_v63 }
 0x12c   :  { %v789_v2 = vpack.c.bf16 %v780_v1, %v779_v0 }
 0x12e   :  { %v422_v4 = vpop.f32.mrf.mxu1  ;;  %1070 = vmatmul.bf16.gmra.mxu0 %v789_v2 }
 0x12f   :  { %v733_v6 = vadd.f32 %v1721_v10, %v422_v4  ;;  %v964_v62 = vpop.f32.mrf.mxu3 }
 0x131   :  { %v627_v5 = vpop.f32.mrf.mxu2  ;;  %v765_v8 = vmul.f32 0.1, %v733_v6  ;;  %vm749_vm14 = vcmp.gt.f32.partialorder %v733_v6, 0.0 }
 0x133   :  { %v781_v15 = vsel %vm749_vm14, %v733_v6, %v765_v8 }
 0x136   :  { %v424_v7 = vpop.f32.mrf.mxu1 }
 0x137   :  { %v734_v9 = vadd.f32 %v1721_v10, %v424_v7  ;;  %v1775_v10 = vld [vmem:[%s1871_s9] ss:$0 sm:$0xff] }
 0x139   :  { %v766_v12 = vmul.f32 0.1, %v734_v9  ;;  %v629_v13 = vpop.f32.mrf.mxu2  ;;  %vm750_vm15 = vcmp.gt.f32.partialorder %v734_v9, 0.0 }
 0x13a   :  { %v1424_v14 = vpack.c.bf16 %v629_v13, %v627_v5  ;;  %v966_v5 = vpop.f32.mrf.mxu3 }
 0x13b   :  { %v782_v16 = vsel %vm750_vm15, %v734_v9, %v766_v12 }
 0x13c   :  { %1425 = vst [vmem:[%s1872_s10] sm:$0xff] %v1424_v14   ;;  %v790_v17 = vpack.c.bf16 %v782_v16, %v781_v15 }
 0x13e   :  { %1075 = vmatmul.bf16.gmra.mxu0 %v790_v17 }
 0x141   :  { %v632_v18 = vpop.f32.mrf.mxu2 }
 0x142   :  { %v969_v14 = vpop.f32.mrf.mxu3 }
 0x149   :  { %v634_v20 = vpop.f32.mrf.mxu2 }
 0x14a   :  { %v1429_v21 = vpack.c.bf16 %v634_v20, %v632_v18 }
 0x14b   :  { %v1041_v22 = vpop.f32.mrf.mxu0 }
 0x14c   :  { %1461 = vst [vmem:[%s1872_s10 + $0x8] sm:$0xff] %v1429_v21   ;;  %v1042_v24 = vadd.f32 %v1041_v22, %v944_v3  ;;  %v971_v22 = vpop.f32.mrf.mxu3 }
 0x14e   :  { %v1085_v25 = vadd.f32 %v1775_v10, %v1042_v24 }
 0x150   :  { %v1101_v26 = vmax.f32 %v1085_v25, 0.0 }
 0x151   :  { %v637_v27 = vpop.f32.mrf.mxu2 }
 0x152   :  { %1117 = vst [vmem:[%s1873_s11] sm:$0xff] %v1101_v26 }
 0x153   :  { %v1043_v28 = vpop.f32.mrf.mxu0 }
 0x154   :  { %v1044_v29 = vadd.f32 %v1043_v28, %v946_v11 }
 0x156   :  { %v1086_v31 = vadd.f32 %v1775_v10, %v1044_v29 }
 0x158   :  { %v1102_v32 = vmax.f32 %v1086_v31, 0.0 }
 0x159   :  { %v639_v33 = vpop.f32.mrf.mxu2 }
 0x15a   :  { %1118 = vst [vmem:[%s1873_s11 + $0x8] sm:$0xff] %v1102_v32  ;;  %v1434_v34 = vpack.c.bf16 %v639_v33, %v637_v27 }
 0x15b   :  { %v1046_v35 = vpop.f32.mrf.mxu0 }
 0x15c   :  { %1462 = vst [vmem:[%s1872_s10 + $0x10] sm:$0xff] %v1434_v34   ;;  %v1047_v36 = vadd.f32 %v1046_v35, %v949_v19 }
 0x15e   :  { %v1087_v37 = vadd.f32 %v1775_v10, %v1047_v36 }
 0x160   :  { %v1103_v39 = vmax.f32 %v1087_v37, 0.0 }
 0x161   :  { %v642_v40 = vpop.f32.mrf.mxu2 }
 0x162   :  { %1119 = vst [vmem:[%s1873_s11 + $0x10] sm:$0xff] %v1103_v39 }
 0x163   :  { %v1048_v41 = vpop.f32.mrf.mxu0 }
 0x164   :  { %v1049_v42 = vadd.f32 %v1048_v41, %v951_v23 }
 0x166   :  { %v1088_v43 = vadd.f32 %v1775_v10, %v1049_v42 }
 0x168   :  { %v1104_v44 = vmax.f32 %v1088_v43, 0.0 }
 0x169   :  { %v644_v45 = vpop.f32.mrf.mxu2 }
 0x16a   :  { %1120 = vst [vmem:[%s1873_s11 + $0x18] sm:$0xff] %v1104_v44  ;;  %v1439_v47 = vpack.c.bf16 %v644_v45, %v642_v40 }
 0x16b   :  { %v1051_v49 = vpop.f32.mrf.mxu0 }
 0x16c   :  { %1463 = vst [vmem:[%s1872_s10 + $0x18] sm:$0xff] %v1439_v47   ;;  %v1052_v50 = vadd.f32 %v1051_v49, %v954_v30  ;;  %v974_v30 = vpop.f32.mrf.mxu3 }
 0x16e   :  { %v1089_v51 = vadd.f32 %v1775_v10, %v1052_v50 }
 0x170   :  { %v1105_v52 = vmax.f32 %v1089_v51, 0.0 }
 0x171   :  { %v647_v53 = vpop.f32.mrf.mxu2 }
 0x172   :  { %1121 = vst [vmem:[%s1873_s11 + $0x20] sm:$0xff] %v1105_v52 }
 0x173   :  { %v1053_v54 = vpop.f32.mrf.mxu0 }
 0x174   :  { %v1054_v55 = vadd.f32 %v1053_v54, %v956_v38  ;;  %v976_v38 = vpop.f32.mrf.mxu3 }
 0x176   :  { %v1090_v56 = vadd.f32 %v1775_v10, %v1054_v55 }
 0x178   :  { %v1106_v57 = vmax.f32 %v1090_v56, 0.0 }
 0x179   :  { %v649_v58 = vpop.f32.mrf.mxu2 }
 0x17a   :  { %1122 = vst [vmem:[%s1873_s11 + $0x28] sm:$0xff] %v1106_v57  ;;  %v1444_v59 = vpack.c.bf16 %v649_v58, %v647_v53 }
 0x17b   :  { %v1056_v60 = vpop.f32.mrf.mxu0 }
 0x17c   :  { %v1057_v61 = vadd.f32 %v1056_v60, %v959_v46  ;;  %1464 = vst [vmem:[%s1872_s10 + $0x20] sm:$0xff] %v1444_v59   ;;  %v979_v44 = vpop.f32.mrf.mxu3 }
 0x17e   :  { %v1091_v63 = vadd.f32 %v1775_v10, %v1057_v61 }
 0x180   :  { %v1107_v0 = vmax.f32 %v1091_v63, 0.0 }
 0x181   :  { %v652_v1 = vpop.f32.mrf.mxu2 }
 0x182   :  { %1123 = vst [vmem:[%s1873_s11 + $0x30] sm:$0xff] %v1107_v0 }
 0x183   :  { %v1058_v2 = vpop.f32.mrf.mxu0 }
 0x184   :  { %v1059_v3 = vadd.f32 %v1058_v2, %v961_v48  ;;  %v981_v50 = vpop.f32.mrf.mxu3 }
 0x186   :  { %v1092_v4 = vadd.f32 %v1775_v10, %v1059_v3 }
 0x188   :  { %v1108_v6 = vmax.f32 %v1092_v4, 0.0 }
 0x189   :  { %v654_v7 = vpop.f32.mrf.mxu2 }
 0x18a   :  { %1124 = vst [vmem:[%s1873_s11 + $0x38] sm:$0xff] %v1108_v6  ;;  %v1449_v8 = vpack.c.bf16 %v654_v7, %v652_v1 }
 0x18b   :  { %v1061_v9 = vpop.f32.mrf.mxu0 }
 0x18c   :  { %v1062_v11 = vadd.f32 %v1061_v9, %v964_v62  ;;  %1465 = vst [vmem:[%s1872_s10 + $0x28] sm:$0xff] %v1449_v8  }
 0x18e   :  { %v1093_v12 = vadd.f32 %v1775_v10, %v1062_v11 }
 0x190   :  { %v1109_v13 = vmax.f32 %v1093_v12, 0.0 }
 0x191   :  { %v657_v15 = vpop.f32.mrf.mxu2 }
 0x192   :  { %1125 = vst [vmem:[%s1873_s11 + $0x40] sm:$0xff] %v1109_v13 }
 0x193   :  { %v1063_v16 = vpop.f32.mrf.mxu0 }
 0x194   :  { %v1064_v17 = vadd.f32 %v1063_v16, %v966_v5 }
 0x196   :  { %v1094_v18 = vadd.f32 %v1775_v10, %v1064_v17 }
 0x198   :  { %v1110_v19 = vmax.f32 %v1094_v18, 0.0 }
 0x199   :  { %v659_v20 = vpop.f32.mrf.mxu2 }
 0x19a   :  { %1126 = vst [vmem:[%s1873_s11 + $0x48] sm:$0xff] %v1110_v19  ;;  %v1454_v21 = vpack.c.bf16 %v659_v20, %v657_v15 }
 0x19b   :  { %v1066_v23 = vpop.f32.mrf.mxu0 }
 0x19c   :  { %v1067_v24 = vadd.f32 %v1066_v23, %v969_v14  ;;  %1466 = vst [vmem:[%s1872_s10 + $0x30] sm:$0xff] %v1454_v21  }
 0x19e   :  { %v1095_v25 = vadd.f32 %v1775_v10, %v1067_v24 }
 0x1a0   :  { %v1111_v26 = vmax.f32 %v1095_v25, 0.0 }
 0x1a1   :  { %v662_v27 = vpop.f32.mrf.mxu2 }
 0x1a2   :  { %1127 = vst [vmem:[%s1873_s11 + $0x50] sm:$0xff] %v1111_v26 }
 0x1a3   :  { %v1068_v28 = vpop.f32.mrf.mxu0 }
 0x1a4   :  { %v1069_v29 = vadd.f32 %v1068_v28, %v971_v22 }
 0x1a6   :  { %v1096_v31 = vadd.f32 %v1775_v10, %v1069_v29 }
 0x1a8   :  { %v1112_v32 = vmax.f32 %v1096_v31, 0.0 }
 0x1a9   :  { %v664_v33 = vpop.f32.mrf.mxu2 }
 0x1aa   :  { %1128 = vst [vmem:[%s1873_s11 + $0x58] sm:$0xff] %v1112_v32  ;;  %v1459_v34 = vpack.c.bf16 %v664_v33, %v662_v27 }
 0x1ab   :  { %v1071_v35 = vpop.f32.mrf.mxu0 }
 0x1ac   :  { %v1072_v36 = vadd.f32 %v1071_v35, %v974_v30  ;;  %1467 = vst [vmem:[%s1872_s10 + $0x38] sm:$0xff] %v1459_v34  }
 0x1ae   :  { %v1097_v37 = vadd.f32 %v1775_v10, %v1072_v36 }
 0x1b0   :  { %v1113_v39 = vmax.f32 %v1097_v37, 0.0 }
 0x1b2   :  { %1129 = vst [vmem:[%s1873_s11 + $0x60] sm:$0xff] %v1113_v39 }
 0x1b3   :  { %v1073_v40 = vpop.f32.mrf.mxu0 }
 0x1b4   :  { %v1074_v41 = vadd.f32 %v1073_v40, %v976_v38 }
 0x1b6   :  { %v1098_v42 = vadd.f32 %v1775_v10, %v1074_v41 }
 0x1b8   :  { %v1114_v43 = vmax.f32 %v1098_v42, 0.0 }
 0x1ba   :  { %1130 = vst [vmem:[%s1873_s11 + $0x68] sm:$0xff] %v1114_v43 }
 0x1bb   :  { %v1076_v45 = vpop.f32.mrf.mxu0 }
 0x1bc   :  { %v1077_v46 = vadd.f32 %v1076_v45, %v979_v44 }
 0x1be   :  { %v1099_v47 = vadd.f32 %v1775_v10, %v1077_v46 }
 0x1c0   :  { %v1115_v49 = vmax.f32 %v1099_v47, 0.0 }
 0x1c2   :  { %1131 = vst [vmem:[%s1873_s11 + $0x70] sm:$0xff] %v1115_v49 }
 0x1c3   :  { %v1078_v51 = vpop.f32.mrf.mxu0 }
 0x1c4   :  { %v1079_v52 = vadd.f32 %v1078_v51, %v981_v50 }
 0x1c6   :  { %v1100_v53 = vadd.f32 %v1775_v10, %v1079_v52 }
 0x1c8   :  { %v1116_v54 = vmax.f32 %v1100_v53, 0.0 }
 0x1ca   :  { %1132 = vst [vmem:[%s1873_s11 + $0x78] sm:$0xff] %v1116_v54 }

</bundles_post_ra>
